<compile_context>
chip_gen: v6e
topology: v6e:2x2x1
jax: 0.10.0
libtpu: 0.0.40
codegen_flags: <defaults>
</compile_context>

<pallas_src>
import math

import jax
import jax.numpy as jnp
from jax import lax
from jax.experimental import pallas as pl
from jax.experimental.pallas import tpu as pltpu


def _make_mha_kernel(H: int, d_k: int, TQ: int, TK: int, D: int,
                     compute_dtype, cache_kv: bool):
    scale = 1.0 / math.sqrt(float(d_k))

    def kernel(q_ref, k_ref, v_ref, wq_ref, wk_ref, wv_ref, wo_ref, bo_ref,
               o_ref, q_sc, m_sc, l_sc, acc_sc, *kv_caches):
        qi = pl.program_id(1)
        ki = pl.program_id(2)

        @pl.when(ki == 0)
        def _init():
            # Project the Q tile once per (batch, q-tile); fold the 1/sqrt(d_k) scale
            # into the projection output (S*D multiplies instead of S*S).
            qp = jnp.dot(q_ref[0], wq_ref[...],
                         preferred_element_type=jnp.float32) * scale
            q_sc[...] = qp.astype(q_sc.dtype)
            m_sc[...] = jnp.full_like(m_sc, -jnp.inf)
            l_sc[...] = jnp.zeros_like(l_sc)
            acc_sc[...] = jnp.zeros_like(acc_sc)

        # Fused K/V projections for ALL heads at once: one (TK, D) x (D, D) matmul each.
        if cache_kv:
            kp_cache, vp_cache = kv_caches

            @pl.when(qi == 0)
            def _project_kv():
                kp_cache[ki] = jnp.dot(
                    k_ref[0], wk_ref[...],
                    preferred_element_type=jnp.float32).astype(compute_dtype)
                vp_cache[ki] = jnp.dot(
                    v_ref[0], wv_ref[...],
                    preferred_element_type=jnp.float32).astype(compute_dtype)

            k_all = kp_cache[ki]                       # (TK, D), projected, cached
            v_all = vp_cache[ki]
        else:
            k_all = jnp.dot(k_ref[0], wk_ref[...],
                            preferred_element_type=jnp.float32).astype(compute_dtype)
            v_all = jnp.dot(v_ref[0], wv_ref[...],
                            preferred_element_type=jnp.float32).astype(compute_dtype)

        q_all = q_sc[...]

        # Per-head online-softmax update with a single resident (TQ, D) accumulator;
        # each head's intermediates die at the scratch store.
        for h in range(H):
            lo, hi = h * d_k, (h + 1) * d_k
            qh = q_all[:, lo:hi]                       # (TQ, d_k), already scaled
            kh = k_all[:, lo:hi]                       # (TK, d_k)
            vh = v_all[:, lo:hi]                       # (TK, d_k)
            # scores = qh @ kh.T without an explicit transpose (contract d_k with d_k).
            s = lax.dot_general(qh, kh, (((1,), (1,)), ((), ())),
                                preferred_element_type=jnp.float32)  # (TQ, TK)
            m_prev = m_sc[h]                           # (TQ, 1)
            m_new = jnp.maximum(m_prev, jnp.max(s, axis=-1, keepdims=True))
            alpha = jnp.exp(m_prev - m_new)            # (TQ, 1)
            p = jnp.exp(s - m_new)                     # (TQ, TK), unnormalized probs
            l_sc[h] = alpha * l_sc[h] + jnp.sum(p, axis=-1, keepdims=True)
            m_sc[h] = m_new
            acc_sc[:, lo:hi] = alpha * acc_sc[:, lo:hi] + jnp.dot(
                p.astype(compute_dtype), vh, preferred_element_type=jnp.float32)

        @pl.when(ki == pl.num_programs(2) - 1)
        def _finalize():
            # Per-head normalization is a multiply by an approximate reciprocal (EUP);
            # the accumulator already holds the concatenated head outputs, so the final
            # projection is a single full-width (TQ, D) x (D, D) MXU matmul.
            for h in range(H):
                lo, hi = h * d_k, (h + 1) * d_k
                inv_l = pl.reciprocal(l_sc[h], approx=True)           # (TQ, 1)
                acc_sc[:, lo:hi] = acc_sc[:, lo:hi] * inv_l
            y = acc_sc[...].astype(compute_dtype)                     # (TQ, D)
            out = jnp.dot(y, wo_ref[...], preferred_element_type=jnp.float32)
            o_ref[0] = (out + bo_ref[...].astype(jnp.float32)).astype(o_ref.dtype)

    return kernel


def multi_head_attention(v, k, q, wq, wk, wv, wo, bo, *, tq=None, tk=None,
                         kv_cache_vmem_budget=16 * 1024 * 1024):
    """Matches MultiHeadAttention.forward(v, k, q).

    v, k, q: (B, S, D)
    wq, wk, wv: (H, d_k, D) per-head projection weights (no bias)
    wo: (D, D), bo: (1, D) final linear weight/bias
    returns: (B, S, D)
    """
    B, S, D = q.shape
    H, d_k, _ = wq.shape
    assert H * d_k == D, "d_model must equal h * d_k"

    TQ = tq if tq is not None else min(S, 128)
    TK = tk if tk is not None else min(S, 128)
    assert S % TQ == 0 and S % TK == 0, "S must be divisible by the chosen tiles"
    nq, nk = S // TQ, S // TK

    compute_dtype = q.dtype
    itemsize = jnp.dtype(compute_dtype).itemsize
    # Cache projected K/V for the whole sequence in VMEM when it fits the budget.
    cache_kv = (2 * S * D * itemsize) <= kv_cache_vmem_budget

    # Fuse per-head projection weights into one (D, D) matrix and pre-transpose in the
    # wrapper (free, outside the kernel) so the kernel contracts the activations' last
    # axis directly — no in-kernel .T / vxpose.
    wq_t = jnp.transpose(wq.reshape(H * d_k, D))           # (D, H*d_k) == (D, D)
    wk_t = jnp.transpose(wk.reshape(H * d_k, D))
    wv_t = jnp.transpose(wv.reshape(H * d_k, D))
    wo_t = jnp.transpose(wo)                               # (D, D)
    bo2 = bo.reshape(1, D)

    kernel = _make_mha_kernel(H, d_k, TQ, TK, D, compute_dtype, cache_kv)

    if cache_kv:
        # K/V only needs to be fetched/projected while qi == 0; afterwards the cached
        # projection is used and the DMA collapses to (repeated) block 0 -> no copy.
        kv_map = lambda b, qi, ki: (b, jnp.where(qi == 0, ki, 0), 0)
        dim_sem = ("parallel", "arbitrary", "arbitrary")
    else:
        kv_map = lambda b, qi, ki: (b, ki, 0)
        dim_sem = ("parallel", "parallel", "arbitrary")

    scratch_shapes = [
        pltpu.VMEM((TQ, D), compute_dtype),          # projected + scaled Q tile
        pltpu.VMEM((H, TQ, 1), jnp.float32),         # running max per head
        pltpu.VMEM((H, TQ, 1), jnp.float32),         # running denominator per head
        pltpu.VMEM((TQ, D), jnp.float32),            # unnormalized per-head outputs
    ]
    if cache_kv:
        scratch_shapes += [
            pltpu.VMEM((nk, TK, D), compute_dtype),  # projected K, whole sequence
            pltpu.VMEM((nk, TK, D), compute_dtype),  # projected V, whole sequence
        ]

    grid_spec = pltpu.PrefetchScalarGridSpec(
        num_scalar_prefetch=0,
        grid=(B, nq, nk),
        in_specs=[
            pl.BlockSpec((1, TQ, D), lambda b, qi, ki: (b, qi, 0)),   # q tile
            pl.BlockSpec((1, TK, D), kv_map),                         # k tile
            pl.BlockSpec((1, TK, D), kv_map),                         # v tile
            pl.BlockSpec((D, D), lambda b, qi, ki: (0, 0)),           # fused Wq^T
            pl.BlockSpec((D, D), lambda b, qi, ki: (0, 0)),           # fused Wk^T
            pl.BlockSpec((D, D), lambda b, qi, ki: (0, 0)),           # fused Wv^T
            pl.BlockSpec((D, D), lambda b, qi, ki: (0, 0)),           # Wo^T
            pl.BlockSpec((1, D), lambda b, qi, ki: (0, 0)),           # bias
        ],
        out_specs=pl.BlockSpec((1, TQ, D), lambda b, qi, ki: (b, qi, 0)),
        scratch_shapes=scratch_shapes,
    )

    return pl.pallas_call(
        kernel,
        out_shape=jax.ShapeDtypeStruct((B, S, D), q.dtype),
        grid_spec=grid_spec,
        compiler_params=pltpu.CompilerParams(
            dimension_semantics=dim_sem,
            vmem_limit_bytes=48 * 1024 * 1024,  # explicit budget; fits v7x's 64 MiB
        ),
    )(q, k, v, wq_t, wk_t, wv_t, wo_t, bo2)


def _xavier_normal(key, shape):
    # shape = (out_features, in_features), matching nn.init.xavier_normal_
    fan_out, fan_in = shape
    std = math.sqrt(2.0 / (fan_in + fan_out))
    return std * jax.random.normal(key, shape, dtype=jnp.float32)


def _reference(v, k, q, wq, wk, wv, wo, bo):
    # Plain-JAX reference matching the PyTorch module exactly.
    H, d_k, D = wq.shape
    outs = []
    for h in range(H):
        qh = q @ wq[h].T
        kh = k @ wk[h].T
        vh = v @ wv[h].T
        s = (qh @ jnp.swapaxes(kh, -1, -2)) / math.sqrt(d_k)
        a = jax.nn.softmax(s, axis=-1)
        outs.append(a @ vh)
    y = jnp.concatenate(outs, axis=-1)
    return y @ wo.T + bo


if __name__ == "__main__":
    # Small shapes consistent with the module: d_model=32, h=4 heads, seq=8, batch=2.
    B, S, D, H = 2, 8, 32, 4
    d_k = D // H

    key = jax.random.PRNGKey(0)
    keys = jax.random.split(key, 8)

    q = jax.random.normal(keys[0], (B, S, D), dtype=jnp.float32)
    k = jax.random.normal(keys[1], (B, S, D), dtype=jnp.float32)
    v = jax.random.normal(keys[2], (B, S, D), dtype=jnp.float32)

    # Per-head projection weights, stacked: (H, d_k, D)
    wq = jnp.stack([_xavier_normal(kk, (d_k, D))
                    for kk in jax.random.split(keys[3], H)])
    wk = jnp.stack([_xavier_normal(kk, (d_k, D))
                    for kk in jax.random.split(keys[4], H)])
    wv = jnp.stack([_xavier_normal(kk, (d_k, D))
                    for kk in jax.random.split(keys[5], H)])

    # Final linear: xavier-normal weight, uniform bias (PyTorch default range).
    wo = _xavier_normal(keys[6], (D, D))
    bound = 1.0 / math.sqrt(D)
    bo = jax.random.uniform(keys[7], (1, D), dtype=jnp.float32,
                            minval=-bound, maxval=bound)

    out = multi_head_attention(v, k, q, wq, wk, wv, wo, bo)
    out = jax.block_until_ready(out)

    ref = _reference(v, k, q, wq, wk, wv, wo, bo)
    assert out.shape == (B, S, D)
    # Tolerance is loosened slightly because the kernel uses the EUP approximate
    # reciprocal (pl.reciprocal(..., approx=True)) for the softmax normalization.
    assert jnp.allclose(out, ref, atol=1e-2, rtol=1e-2), "mismatch vs reference"

    print("KERNEL_OK")
</pallas_src>

<mosaic_0001>
module attributes {stable_mosaic.version = 11 : i64} {
  func.func @kernel(%arg0: i32, %arg1: i32, %arg2: i32, %arg3: memref<1x8x32xf32, #tpu.memory_space<vmem>>, %arg4: memref<1x8x32xf32, #tpu.memory_space<vmem>>, %arg5: memref<1x8x32xf32, #tpu.memory_space<vmem>>, %arg6: memref<32x32xf32, #tpu.memory_space<vmem>>, %arg7: memref<32x32xf32, #tpu.memory_space<vmem>>, %arg8: memref<32x32xf32, #tpu.memory_space<vmem>>, %arg9: memref<32x32xf32, #tpu.memory_space<vmem>>, %arg10: memref<1x32xf32, #tpu.memory_space<vmem>>, %arg11: memref<1x8x32xf32, #tpu.memory_space<vmem>>, %arg12: memref<8x32xf32, #tpu.memory_space<vmem>>, %arg13: memref<4x8x1xf32, #tpu.memory_space<vmem>>, %arg14: memref<4x8x1xf32, #tpu.memory_space<vmem>>, %arg15: memref<8x32xf32, #tpu.memory_space<vmem>>, %arg16: memref<1x8x32xf32, #tpu.memory_space<vmem>>, %arg17: memref<1x8x32xf32, #tpu.memory_space<vmem>>) attributes {dimension_semantics = [#tpu.dimension_semantics<parallel>, #tpu.dimension_semantics<arbitrary>, #tpu.dimension_semantics<arbitrary>], iteration_bounds = array<i64: 2, 1, 1>, scalar_prefetch = 0 : i64, scratch_operands = 6 : i64, tpu.core_type = #tpu.core_type<tc>, window_params = [{transform_indices = @transform_0, window_bounds = array<i64: 1, 8, 32>}, {transform_indices = @transform_1, window_bounds = array<i64: 1, 8, 32>}, {transform_indices = @transform_2, window_bounds = array<i64: 1, 8, 32>}, {pipeline_mode = #tpu.pipeline_mode<synchronous>, transform_indices = @transform_3, window_bounds = array<i64: 32, 32>}, {pipeline_mode = #tpu.pipeline_mode<synchronous>, transform_indices = @transform_4, window_bounds = array<i64: 32, 32>}, {pipeline_mode = #tpu.pipeline_mode<synchronous>, transform_indices = @transform_5, window_bounds = array<i64: 32, 32>}, {pipeline_mode = #tpu.pipeline_mode<synchronous>, transform_indices = @transform_6, window_bounds = array<i64: 32, 32>}, {pipeline_mode = #tpu.pipeline_mode<synchronous>, transform_indices = @transform_7, window_bounds = array<i64: 1, 32>}, {transform_indices = @transform_8, window_bounds = array<i64: 1, 8, 32>}]} {
    %c0_i32 = arith.constant 0 : i32
    %0 = arith.cmpi eq, %arg2, %c0_i32 : i32
    %1 = arith.extui %0 : i1 to i32
    %c0_i32_0 = arith.constant 0 : i32
    %2 = arith.cmpi ne, %1, %c0_i32_0 : i32
    scf.if %2 {
      %c0_83 = arith.constant 0 : index
      %c0_84 = arith.constant 0 : index
      %c0_85 = arith.constant 0 : index
      %144 = vector.load %arg3[%c0_83, %c0_84, %c0_85] : memref<1x8x32xf32, #tpu.memory_space<vmem>>, vector<1x8x32xf32>
      %145 = vector.shape_cast %144 : vector<1x8x32xf32> to vector<8x32xf32>
      %c0_86 = arith.constant 0 : index
      %c0_87 = arith.constant 0 : index
      %146 = vector.load %arg6[%c0_86, %c0_87] : memref<32x32xf32, #tpu.memory_space<vmem>>, vector<32x32xf32>
      %cst_88 = arith.constant dense<0.000000e+00> : vector<8x32xf32>
      %147 = tpu.matmul %145, %146, %cst_88 {dimension_numbers = #tpu.dot_dimension_numbers<[1], [0], [0], [1], [0, 0, 1, 1], [], []>} : vector<8x32xf32>, vector<32x32xf32>, vector<8x32xf32> -> vector<8x32xf32>
      %cst_89 = arith.constant 0.353553385 : f32
      %148 = vector.broadcast %cst_89 : f32 to vector<8x32xf32>
      %149 = arith.mulf %147, %148 : vector<8x32xf32>
      %c0_90 = arith.constant 0 : index
      %c0_91 = arith.constant 0 : index
      %150 = vector.load %arg12[%c0_90, %c0_91] : memref<8x32xf32, #tpu.memory_space<vmem>>, vector<8x32xf32>
      tpu.vector_store %arg12[%c0_90, %c0_91], %149 {strides = array<i32>} : memref<8x32xf32, #tpu.memory_space<vmem>>, vector<8x32xf32>,
      %cst_92 = arith.constant 0xFF800000 : f32
      %151 = vector.broadcast %cst_92 : f32 to vector<4x8x1xf32>
      %c0_93 = arith.constant 0 : index
      %c0_94 = arith.constant 0 : index
      %c0_95 = arith.constant 0 : index
      %152 = vector.load %arg13[%c0_93, %c0_94, %c0_95] : memref<4x8x1xf32, #tpu.memory_space<vmem>>, vector<4x8x1xf32>
      tpu.vector_store %arg13[%c0_93, %c0_94, %c0_95], %151 {strides = array<i32>} : memref<4x8x1xf32, #tpu.memory_space<vmem>>, vector<4x8x1xf32>,
      %cst_96 = arith.constant 0.000000e+00 : f32
      %153 = vector.broadcast %cst_96 : f32 to vector<4x8x1xf32>
      %c0_97 = arith.constant 0 : index
      %c0_98 = arith.constant 0 : index
      %c0_99 = arith.constant 0 : index
      %154 = vector.load %arg14[%c0_97, %c0_98, %c0_99] : memref<4x8x1xf32, #tpu.memory_space<vmem>>, vector<4x8x1xf32>
      tpu.vector_store %arg14[%c0_97, %c0_98, %c0_99], %153 {strides = array<i32>} : memref<4x8x1xf32, #tpu.memory_space<vmem>>, vector<4x8x1xf32>,
      %cst_100 = arith.constant 0.000000e+00 : f32
      %155 = vector.broadcast %cst_100 : f32 to vector<8x32xf32>
      %c0_101 = arith.constant 0 : index
      %c0_102 = arith.constant 0 : index
      %156 = vector.load %arg15[%c0_101, %c0_102] : memref<8x32xf32, #tpu.memory_space<vmem>>, vector<8x32xf32>
      tpu.vector_store %arg15[%c0_101, %c0_102], %155 {strides = array<i32>} : memref<8x32xf32, #tpu.memory_space<vmem>>, vector<8x32xf32>,
    } else {
    }
    %c0_i32_1 = arith.constant 0 : i32
    %3 = arith.cmpi eq, %arg1, %c0_i32_1 : i32
    %4 = arith.extui %3 : i1 to i32
    %c0_i32_2 = arith.constant 0 : i32
    %5 = arith.cmpi ne, %4, %c0_i32_2 : i32
    scf.if %5 {
      %c0_83 = arith.constant 0 : index
      %c0_84 = arith.constant 0 : index
      %c0_85 = arith.constant 0 : index
      %144 = vector.load %arg4[%c0_83, %c0_84, %c0_85] : memref<1x8x32xf32, #tpu.memory_space<vmem>>, vector<1x8x32xf32>
      %145 = vector.shape_cast %144 : vector<1x8x32xf32> to vector<8x32xf32>
      %c0_86 = arith.constant 0 : index
      %c0_87 = arith.constant 0 : index
      %146 = vector.load %arg7[%c0_86, %c0_87] : memref<32x32xf32, #tpu.memory_space<vmem>>, vector<32x32xf32>
      %cst_88 = arith.constant dense<0.000000e+00> : vector<8x32xf32>
      %147 = tpu.matmul %145, %146, %cst_88 {dimension_numbers = #tpu.dot_dimension_numbers<[1], [0], [0], [1], [0, 0, 1, 1], [], []>} : vector<8x32xf32>, vector<32x32xf32>, vector<8x32xf32> -> vector<8x32xf32>
      %148 = arith.index_cast %arg2 : i32 to index
      %c0_89 = arith.constant 0 : index
      %c0_90 = arith.constant 0 : index
      %149 = vector.load %arg16[%148, %c0_89, %c0_90] : memref<1x8x32xf32, #tpu.memory_space<vmem>>, vector<1x8x32xf32>
      %150 = vector.shape_cast %149 : vector<1x8x32xf32> to vector<8x32xf32>
      %151 = vector.shape_cast %147 : vector<8x32xf32> to vector<1x8x32xf32>
      tpu.vector_store %arg16[%148, %c0_89, %c0_90], %151 {strides = array<i32>} : memref<1x8x32xf32, #tpu.memory_space<vmem>>, vector<1x8x32xf32>,
      %c0_91 = arith.constant 0 : index
      %c0_92 = arith.constant 0 : index
      %c0_93 = arith.constant 0 : index
      %152 = vector.load %arg5[%c0_91, %c0_92, %c0_93] : memref<1x8x32xf32, #tpu.memory_space<vmem>>, vector<1x8x32xf32>
      %153 = vector.shape_cast %152 : vector<1x8x32xf32> to vector<8x32xf32>
      %c0_94 = arith.constant 0 : index
      %c0_95 = arith.constant 0 : index
      %154 = vector.load %arg8[%c0_94, %c0_95] : memref<32x32xf32, #tpu.memory_space<vmem>>, vector<32x32xf32>
      %cst_96 = arith.constant dense<0.000000e+00> : vector<8x32xf32>
      %155 = tpu.matmul %153, %154, %cst_96 {dimension_numbers = #tpu.dot_dimension_numbers<[1], [0], [0], [1], [0, 0, 1, 1], [], []>} : vector<8x32xf32>, vector<32x32xf32>, vector<8x32xf32> -> vector<8x32xf32>
      %156 = arith.index_cast %arg2 : i32 to index
      %c0_97 = arith.constant 0 : index
      %c0_98 = arith.constant 0 : index
      %157 = vector.load %arg17[%156, %c0_97, %c0_98] : memref<1x8x32xf32, #tpu.memory_space<vmem>>, vector<1x8x32xf32>
      %158 = vector.shape_cast %157 : vector<1x8x32xf32> to vector<8x32xf32>
      %159 = vector.shape_cast %155 : vector<8x32xf32> to vector<1x8x32xf32>
      tpu.vector_store %arg17[%156, %c0_97, %c0_98], %159 {strides = array<i32>} : memref<1x8x32xf32, #tpu.memory_space<vmem>>, vector<1x8x32xf32>,
    } else {
    }
    %6 = arith.index_cast %arg2 : i32 to index
    %c0 = arith.constant 0 : index
    %c0_3 = arith.constant 0 : index
    %7 = vector.load %arg16[%6, %c0, %c0_3] : memref<1x8x32xf32, #tpu.memory_space<vmem>>, vector<1x8x32xf32>
    %8 = vector.shape_cast %7 : vector<1x8x32xf32> to vector<8x32xf32>
    %9 = arith.index_cast %arg2 : i32 to index
    %c0_4 = arith.constant 0 : index
    %c0_5 = arith.constant 0 : index
    %10 = vector.load %arg17[%9, %c0_4, %c0_5] : memref<1x8x32xf32, #tpu.memory_space<vmem>>, vector<1x8x32xf32>
    %11 = vector.shape_cast %10 : vector<1x8x32xf32> to vector<8x32xf32>
    %c0_6 = arith.constant 0 : index
    %c0_7 = arith.constant 0 : index
    %12 = vector.load %arg12[%c0_6, %c0_7] : memref<8x32xf32, #tpu.memory_space<vmem>>, vector<8x32xf32>
    %13 = vector.extract_strided_slice %12 {offsets = [0, 0], sizes = [8, 8], strides = [1, 1]} : vector<8x32xf32> to vector<8x8xf32>
    %14 = vector.extract_strided_slice %8 {offsets = [0, 0], sizes = [8, 8], strides = [1, 1]} : vector<8x32xf32> to vector<8x8xf32>
    %15 = vector.extract_strided_slice %11 {offsets = [0, 0], sizes = [8, 8], strides = [1, 1]} : vector<8x32xf32> to vector<8x8xf32>
    %cst = arith.constant dense<0.000000e+00> : vector<8x8xf32>
    %16 = tpu.matmul %13, %14, %cst {dimension_numbers = #tpu.dot_dimension_numbers<[1], [1], [0], [0], [0, 0, 1, 0], [], []>} : vector<8x8xf32>, vector<8x8xf32>, vector<8x8xf32> -> vector<8x8xf32>
    %c0_8 = arith.constant 0 : index
    %c0_9 = arith.constant 0 : index
    %c0_10 = arith.constant 0 : index
    %17 = vector.load %arg13[%c0_8, %c0_9, %c0_10] : memref<4x8x1xf32, #tpu.memory_space<vmem>>, vector<1x8x1xf32>
    %18 = vector.shape_cast %17 : vector<1x8x1xf32> to vector<8x1xf32>
    %cst_11 = arith.constant dense<0xFF800000> : vector<8xf32>
    %19 = vector.multi_reduction <maximumf>, %16, %cst_11 [1] : vector<8x8xf32> to vector<8xf32>
    %20 = vector.shape_cast %19 : vector<8xf32> to vector<8x1xf32>
    %21 = arith.maximumf %18, %20 : vector<8x1xf32>
    %22 = arith.subf %18, %21 : vector<8x1xf32>
    %23 = math.exp %22 : vector<8x1xf32>
    %24 = vector.broadcast %21 : vector<8x1xf32> to vector<8x8xf32>
    %25 = arith.subf %16, %24 : vector<8x8xf32>
    %26 = math.exp %25 : vector<8x8xf32>
    %c0_12 = arith.constant 0 : index
    %c0_13 = arith.constant 0 : index
    %c0_14 = arith.constant 0 : index
    %27 = vector.load %arg14[%c0_12, %c0_13, %c0_14] : memref<4x8x1xf32, #tpu.memory_space<vmem>>, vector<1x8x1xf32>
    %28 = vector.shape_cast %27 : vector<1x8x1xf32> to vector<8x1xf32>
    %29 = arith.mulf %23, %28 : vector<8x1xf32>
    %cst_15 = arith.constant dense<0.000000e+00> : vector<8xf32>
    %30 = vector.multi_reduction <add>, %26, %cst_15 [1] : vector<8x8xf32> to vector<8xf32>
    %31 = vector.shape_cast %30 : vector<8xf32> to vector<8x1xf32>
    %32 = arith.addf %29, %31 : vector<8x1xf32>
    %c0_16 = arith.constant 0 : index
    %c0_17 = arith.constant 0 : index
    %c0_18 = arith.constant 0 : index
    %33 = vector.load %arg14[%c0_16, %c0_17, %c0_18] : memref<4x8x1xf32, #tpu.memory_space<vmem>>, vector<1x8x1xf32>
    %34 = vector.shape_cast %33 : vector<1x8x1xf32> to vector<8x1xf32>
    %35 = vector.shape_cast %32 : vector<8x1xf32> to vector<1x8x1xf32>
    tpu.vector_store %arg14[%c0_16, %c0_17, %c0_18], %35 {strides = array<i32>} : memref<4x8x1xf32, #tpu.memory_space<vmem>>, vector<1x8x1xf32>,
    %c0_19 = arith.constant 0 : index
    %c0_20 = arith.constant 0 : index
    %c0_21 = arith.constant 0 : index
    %36 = vector.load %arg13[%c0_19, %c0_20, %c0_21] : memref<4x8x1xf32, #tpu.memory_space<vmem>>, vector<1x8x1xf32>
    %37 = vector.shape_cast %36 : vector<1x8x1xf32> to vector<8x1xf32>
    %38 = vector.shape_cast %21 : vector<8x1xf32> to vector<1x8x1xf32>
    tpu.vector_store %arg13[%c0_19, %c0_20, %c0_21], %38 {strides = array<i32>} : memref<4x8x1xf32, #tpu.memory_space<vmem>>, vector<1x8x1xf32>,
    %c0_22 = arith.constant 0 : index
    %c0_23 = arith.constant 0 : index
    %39 = vector.load %arg15[%c0_22, %c0_23] : memref<8x32xf32, #tpu.memory_space<vmem>>, vector<8x8xf32>
    %40 = vector.broadcast %23 : vector<8x1xf32> to vector<8x8xf32>
    %41 = arith.mulf %40, %39 : vector<8x8xf32>
    %cst_24 = arith.constant dense<0.000000e+00> : vector<8x8xf32>
    %42 = tpu.matmul %26, %15, %cst_24 {dimension_numbers = #tpu.dot_dimension_numbers<[1], [0], [0], [1], [0, 0, 1, 1], [], []>} : vector<8x8xf32>, vector<8x8xf32>, vector<8x8xf32> -> vector<8x8xf32>
    %43 = arith.addf %41, %42 : vector<8x8xf32>
    %c0_25 = arith.constant 0 : index
    %c0_26 = arith.constant 0 : index
    %44 = vector.load %arg15[%c0_25, %c0_26] : memref<8x32xf32, #tpu.memory_space<vmem>>, vector<8x8xf32>
    tpu.vector_store %arg15[%c0_25, %c0_26], %43 {strides = array<i32>} : memref<8x32xf32, #tpu.memory_space<vmem>>, vector<8x8xf32>,
    %45 = vector.extract_strided_slice %12 {offsets = [0, 8], sizes = [8, 8], strides = [1, 1]} : vector<8x32xf32> to vector<8x8xf32>
    %46 = vector.extract_strided_slice %8 {offsets = [0, 8], sizes = [8, 8], strides = [1, 1]} : vector<8x32xf32> to vector<8x8xf32>
    %47 = vector.extract_strided_slice %11 {offsets = [0, 8], sizes = [8, 8], strides = [1, 1]} : vector<8x32xf32> to vector<8x8xf32>
    %cst_27 = arith.constant dense<0.000000e+00> : vector<8x8xf32>
    %48 = tpu.matmul %45, %46, %cst_27 {dimension_numbers = #tpu.dot_dimension_numbers<[1], [1], [0], [0], [0, 0, 1, 0], [], []>} : vector<8x8xf32>, vector<8x8xf32>, vector<8x8xf32> -> vector<8x8xf32>
    %c1 = arith.constant 1 : index
    %c0_28 = arith.constant 0 : index
    %c0_29 = arith.constant 0 : index
    %49 = vector.load %arg13[%c1, %c0_28, %c0_29] : memref<4x8x1xf32, #tpu.memory_space<vmem>>, vector<1x8x1xf32>
    %50 = vector.shape_cast %49 : vector<1x8x1xf32> to vector<8x1xf32>
    %cst_30 = arith.constant dense<0xFF800000> : vector<8xf32>
    %51 = vector.multi_reduction <maximumf>, %48, %cst_30 [1] : vector<8x8xf32> to vector<8xf32>
    %52 = vector.shape_cast %51 : vector<8xf32> to vector<8x1xf32>
    %53 = arith.maximumf %50, %52 : vector<8x1xf32>
    %54 = arith.subf %50, %53 : vector<8x1xf32>
    %55 = math.exp %54 : vector<8x1xf32>
    %56 = vector.broadcast %53 : vector<8x1xf32> to vector<8x8xf32>
    %57 = arith.subf %48, %56 : vector<8x8xf32>
    %58 = math.exp %57 : vector<8x8xf32>
    %c1_31 = arith.constant 1 : index
    %c0_32 = arith.constant 0 : index
    %c0_33 = arith.constant 0 : index
    %59 = vector.load %arg14[%c1_31, %c0_32, %c0_33] : memref<4x8x1xf32, #tpu.memory_space<vmem>>, vector<1x8x1xf32>
    %60 = vector.shape_cast %59 : vector<1x8x1xf32> to vector<8x1xf32>
    %61 = arith.mulf %55, %60 : vector<8x1xf32>
    %cst_34 = arith.constant dense<0.000000e+00> : vector<8xf32>
    %62 = vector.multi_reduction <add>, %58, %cst_34 [1] : vector<8x8xf32> to vector<8xf32>
    %63 = vector.shape_cast %62 : vector<8xf32> to vector<8x1xf32>
    %64 = arith.addf %61, %63 : vector<8x1xf32>
    %c1_35 = arith.constant 1 : index
    %c0_36 = arith.constant 0 : index
    %c0_37 = arith.constant 0 : index
    %65 = vector.load %arg14[%c1_35, %c0_36, %c0_37] : memref<4x8x1xf32, #tpu.memory_space<vmem>>, vector<1x8x1xf32>
    %66 = vector.shape_cast %65 : vector<1x8x1xf32> to vector<8x1xf32>
    %67 = vector.shape_cast %64 : vector<8x1xf32> to vector<1x8x1xf32>
    tpu.vector_store %arg14[%c1_35, %c0_36, %c0_37], %67 {strides = array<i32>} : memref<4x8x1xf32, #tpu.memory_space<vmem>>, vector<1x8x1xf32>,
    %c1_38 = arith.constant 1 : index
    %c0_39 = arith.constant 0 : index
    %c0_40 = arith.constant 0 : index
    %68 = vector.load %arg13[%c1_38, %c0_39, %c0_40] : memref<4x8x1xf32, #tpu.memory_space<vmem>>, vector<1x8x1xf32>
    %69 = vector.shape_cast %68 : vector<1x8x1xf32> to vector<8x1xf32>
    %70 = vector.shape_cast %53 : vector<8x1xf32> to vector<1x8x1xf32>
    tpu.vector_store %arg13[%c1_38, %c0_39, %c0_40], %70 {strides = array<i32>} : memref<4x8x1xf32, #tpu.memory_space<vmem>>, vector<1x8x1xf32>,
    %c0_41 = arith.constant 0 : index
    %c8 = arith.constant 8 : index
    %71 = vector.load %arg15[%c0_41, %c8] : memref<8x32xf32, #tpu.memory_space<vmem>>, vector<8x8xf32>
    %72 = vector.broadcast %55 : vector<8x1xf32> to vector<8x8xf32>
    %73 = arith.mulf %72, %71 : vector<8x8xf32>
    %cst_42 = arith.constant dense<0.000000e+00> : vector<8x8xf32>
    %74 = tpu.matmul %58, %47, %cst_42 {dimension_numbers = #tpu.dot_dimension_numbers<[1], [0], [0], [1], [0, 0, 1, 1], [], []>} : vector<8x8xf32>, vector<8x8xf32>, vector<8x8xf32> -> vector<8x8xf32>
    %75 = arith.addf %73, %74 : vector<8x8xf32>
    %c0_43 = arith.constant 0 : index
    %c8_44 = arith.constant 8 : index
    %76 = vector.load %arg15[%c0_43, %c8_44] : memref<8x32xf32, #tpu.memory_space<vmem>>, vector<8x8xf32>
    tpu.vector_store %arg15[%c0_43, %c8_44], %75 {strides = array<i32>} : memref<8x32xf32, #tpu.memory_space<vmem>>, vector<8x8xf32>,
    %77 = vector.extract_strided_slice %12 {offsets = [0, 16], sizes = [8, 8], strides = [1, 1]} : vector<8x32xf32> to vector<8x8xf32>
    %78 = vector.extract_strided_slice %8 {offsets = [0, 16], sizes = [8, 8], strides = [1, 1]} : vector<8x32xf32> to vector<8x8xf32>
    %79 = vector.extract_strided_slice %11 {offsets = [0, 16], sizes = [8, 8], strides = [1, 1]} : vector<8x32xf32> to vector<8x8xf32>
    %cst_45 = arith.constant dense<0.000000e+00> : vector<8x8xf32>
    %80 = tpu.matmul %77, %78, %cst_45 {dimension_numbers = #tpu.dot_dimension_numbers<[1], [1], [0], [0], [0, 0, 1, 0], [], []>} : vector<8x8xf32>, vector<8x8xf32>, vector<8x8xf32> -> vector<8x8xf32>
    %c2 = arith.constant 2 : index
    %c0_46 = arith.constant 0 : index
    %c0_47 = arith.constant 0 : index
    %81 = vector.load %arg13[%c2, %c0_46, %c0_47] : memref<4x8x1xf32, #tpu.memory_space<vmem>>, vector<1x8x1xf32>
    %82 = vector.shape_cast %81 : vector<1x8x1xf32> to vector<8x1xf32>
    %cst_48 = arith.constant dense<0xFF800000> : vector<8xf32>
    %83 = vector.multi_reduction <maximumf>, %80, %cst_48 [1] : vector<8x8xf32> to vector<8xf32>
    %84 = vector.shape_cast %83 : vector<8xf32> to vector<8x1xf32>
    %85 = arith.maximumf %82, %84 : vector<8x1xf32>
    %86 = arith.subf %82, %85 : vector<8x1xf32>
    %87 = math.exp %86 : vector<8x1xf32>
    %88 = vector.broadcast %85 : vector<8x1xf32> to vector<8x8xf32>
    %89 = arith.subf %80, %88 : vector<8x8xf32>
    %90 = math.exp %89 : vector<8x8xf32>
    %c2_49 = arith.constant 2 : index
    %c0_50 = arith.constant 0 : index
    %c0_51 = arith.constant 0 : index
    %91 = vector.load %arg14[%c2_49, %c0_50, %c0_51] : memref<4x8x1xf32, #tpu.memory_space<vmem>>, vector<1x8x1xf32>
    %92 = vector.shape_cast %91 : vector<1x8x1xf32> to vector<8x1xf32>
    %93 = arith.mulf %87, %92 : vector<8x1xf32>
    %cst_52 = arith.constant dense<0.000000e+00> : vector<8xf32>
    %94 = vector.multi_reduction <add>, %90, %cst_52 [1] : vector<8x8xf32> to vector<8xf32>
    %95 = vector.shape_cast %94 : vector<8xf32> to vector<8x1xf32>
    %96 = arith.addf %93, %95 : vector<8x1xf32>
    %c2_53 = arith.constant 2 : index
    %c0_54 = arith.constant 0 : index
    %c0_55 = arith.constant 0 : index
    %97 = vector.load %arg14[%c2_53, %c0_54, %c0_55] : memref<4x8x1xf32, #tpu.memory_space<vmem>>, vector<1x8x1xf32>
    %98 = vector.shape_cast %97 : vector<1x8x1xf32> to vector<8x1xf32>
    %99 = vector.shape_cast %96 : vector<8x1xf32> to vector<1x8x1xf32>
    tpu.vector_store %arg14[%c2_53, %c0_54, %c0_55], %99 {strides = array<i32>} : memref<4x8x1xf32, #tpu.memory_space<vmem>>, vector<1x8x1xf32>,
    %c2_56 = arith.constant 2 : index
    %c0_57 = arith.constant 0 : index
    %c0_58 = arith.constant 0 : index
    %100 = vector.load %arg13[%c2_56, %c0_57, %c0_58] : memref<4x8x1xf32, #tpu.memory_space<vmem>>, vector<1x8x1xf32>
    %101 = vector.shape_cast %100 : vector<1x8x1xf32> to vector<8x1xf32>
    %102 = vector.shape_cast %85 : vector<8x1xf32> to vector<1x8x1xf32>
    tpu.vector_store %arg13[%c2_56, %c0_57, %c0_58], %102 {strides = array<i32>} : memref<4x8x1xf32, #tpu.memory_space<vmem>>, vector<1x8x1xf32>,
    %c0_59 = arith.constant 0 : index
    %c16 = arith.constant 16 : index
    %103 = vector.load %arg15[%c0_59, %c16] : memref<8x32xf32, #tpu.memory_space<vmem>>, vector<8x8xf32>
    %104 = vector.broadcast %87 : vector<8x1xf32> to vector<8x8xf32>
    %105 = arith.mulf %104, %103 : vector<8x8xf32>
    %cst_60 = arith.constant dense<0.000000e+00> : vector<8x8xf32>
    %106 = tpu.matmul %90, %79, %cst_60 {dimension_numbers = #tpu.dot_dimension_numbers<[1], [0], [0], [1], [0, 0, 1, 1], [], []>} : vector<8x8xf32>, vector<8x8xf32>, vector<8x8xf32> -> vector<8x8xf32>
    %107 = arith.addf %105, %106 : vector<8x8xf32>
    %c0_61 = arith.constant 0 : index
    %c16_62 = arith.constant 16 : index
    %108 = vector.load %arg15[%c0_61, %c16_62] : memref<8x32xf32, #tpu.memory_space<vmem>>, vector<8x8xf32>
    tpu.vector_store %arg15[%c0_61, %c16_62], %107 {strides = array<i32>} : memref<8x32xf32, #tpu.memory_space<vmem>>, vector<8x8xf32>,
    %109 = vector.extract_strided_slice %12 {offsets = [0, 24], sizes = [8, 8], strides = [1, 1]} : vector<8x32xf32> to vector<8x8xf32>
    %110 = vector.extract_strided_slice %8 {offsets = [0, 24], sizes = [8, 8], strides = [1, 1]} : vector<8x32xf32> to vector<8x8xf32>
    %111 = vector.extract_strided_slice %11 {offsets = [0, 24], sizes = [8, 8], strides = [1, 1]} : vector<8x32xf32> to vector<8x8xf32>
    %cst_63 = arith.constant dense<0.000000e+00> : vector<8x8xf32>
    %112 = tpu.matmul %109, %110, %cst_63 {dimension_numbers = #tpu.dot_dimension_numbers<[1], [1], [0], [0], [0, 0, 1, 0], [], []>} : vector<8x8xf32>, vector<8x8xf32>, vector<8x8xf32> -> vector<8x8xf32>
    %c3 = arith.constant 3 : index
    %c0_64 = arith.constant 0 : index
    %c0_65 = arith.constant 0 : index
    %113 = vector.load %arg13[%c3, %c0_64, %c0_65] : memref<4x8x1xf32, #tpu.memory_space<vmem>>, vector<1x8x1xf32>
    %114 = vector.shape_cast %113 : vector<1x8x1xf32> to vector<8x1xf32>
    %cst_66 = arith.constant dense<0xFF800000> : vector<8xf32>
    %115 = vector.multi_reduction <maximumf>, %112, %cst_66 [1] : vector<8x8xf32> to vector<8xf32>
    %116 = vector.shape_cast %115 : vector<8xf32> to vector<8x1xf32>
    %117 = arith.maximumf %114, %116 : vector<8x1xf32>
    %118 = arith.subf %114, %117 : vector<8x1xf32>
    %119 = math.exp %118 : vector<8x1xf32>
    %120 = vector.broadcast %117 : vector<8x1xf32> to vector<8x8xf32>
    %121 = arith.subf %112, %120 : vector<8x8xf32>
    %122 = math.exp %121 : vector<8x8xf32>
    %c3_67 = arith.constant 3 : index
    %c0_68 = arith.constant 0 : index
    %c0_69 = arith.constant 0 : index
    %123 = vector.load %arg14[%c3_67, %c0_68, %c0_69] : memref<4x8x1xf32, #tpu.memory_space<vmem>>, vector<1x8x1xf32>
    %124 = vector.shape_cast %123 : vector<1x8x1xf32> to vector<8x1xf32>
    %125 = arith.mulf %119, %124 : vector<8x1xf32>
    %cst_70 = arith.constant dense<0.000000e+00> : vector<8xf32>
    %126 = vector.multi_reduction <add>, %122, %cst_70 [1] : vector<8x8xf32> to vector<8xf32>
    %127 = vector.shape_cast %126 : vector<8xf32> to vector<8x1xf32>
    %128 = arith.addf %125, %127 : vector<8x1xf32>
    %c3_71 = arith.constant 3 : index
    %c0_72 = arith.constant 0 : index
    %c0_73 = arith.constant 0 : index
    %129 = vector.load %arg14[%c3_71, %c0_72, %c0_73] : memref<4x8x1xf32, #tpu.memory_space<vmem>>, vector<1x8x1xf32>
    %130 = vector.shape_cast %129 : vector<1x8x1xf32> to vector<8x1xf32>
    %131 = vector.shape_cast %128 : vector<8x1xf32> to vector<1x8x1xf32>
    tpu.vector_store %arg14[%c3_71, %c0_72, %c0_73], %131 {strides = array<i32>} : memref<4x8x1xf32, #tpu.memory_space<vmem>>, vector<1x8x1xf32>,
    %c3_74 = arith.constant 3 : index
    %c0_75 = arith.constant 0 : index
    %c0_76 = arith.constant 0 : index
    %132 = vector.load %arg13[%c3_74, %c0_75, %c0_76] : memref<4x8x1xf32, #tpu.memory_space<vmem>>, vector<1x8x1xf32>
    %133 = vector.shape_cast %132 : vector<1x8x1xf32> to vector<8x1xf32>
    %134 = vector.shape_cast %117 : vector<8x1xf32> to vector<1x8x1xf32>
    tpu.vector_store %arg13[%c3_74, %c0_75, %c0_76], %134 {strides = array<i32>} : memref<4x8x1xf32, #tpu.memory_space<vmem>>, vector<1x8x1xf32>,
    %c0_77 = arith.constant 0 : index
    %c24 = arith.constant 24 : index
    %135 = vector.load %arg15[%c0_77, %c24] : memref<8x32xf32, #tpu.memory_space<vmem>>, vector<8x8xf32>
    %136 = vector.broadcast %119 : vector<8x1xf32> to vector<8x8xf32>
    %137 = arith.mulf %136, %135 : vector<8x8xf32>
    %cst_78 = arith.constant dense<0.000000e+00> : vector<8x8xf32>
    %138 = tpu.matmul %122, %111, %cst_78 {dimension_numbers = #tpu.dot_dimension_numbers<[1], [0], [0], [1], [0, 0, 1, 1], [], []>} : vector<8x8xf32>, vector<8x8xf32>, vector<8x8xf32> -> vector<8x8xf32>
    %139 = arith.addf %137, %138 : vector<8x8xf32>
    %c0_79 = arith.constant 0 : index
    %c24_80 = arith.constant 24 : index
    %140 = vector.load %arg15[%c0_79, %c24_80] : memref<8x32xf32, #tpu.memory_space<vmem>>, vector<8x8xf32>
    tpu.vector_store %arg15[%c0_79, %c24_80], %139 {strides = array<i32>} : memref<8x32xf32, #tpu.memory_space<vmem>>, vector<8x8xf32>,
    %c0_i32_81 = arith.constant 0 : i32
    %141 = arith.cmpi eq, %arg2, %c0_i32_81 : i32
    %142 = arith.extui %141 : i1 to i32
    %c0_i32_82 = arith.constant 0 : i32
    %143 = arith.cmpi ne, %142, %c0_i32_82 : i32
    scf.if %143 {
      %c0_83 = arith.constant 0 : index
      %c0_84 = arith.constant 0 : index
      %c0_85 = arith.constant 0 : index
      %144 = vector.load %arg14[%c0_83, %c0_84, %c0_85] : memref<4x8x1xf32, #tpu.memory_space<vmem>>, vector<1x8x1xf32>
      %145 = vector.shape_cast %144 : vector<1x8x1xf32> to vector<8x1xf32>
      %146 = tpu.reciprocal %145 {approx = true} : vector<8x1xf32> -> vector<8x1xf32>
      %c0_86 = arith.constant 0 : index
      %c0_87 = arith.constant 0 : index
      %147 = vector.load %arg15[%c0_86, %c0_87] : memref<8x32xf32, #tpu.memory_space<vmem>>, vector<8x8xf32>
      %148 = vector.broadcast %146 : vector<8x1xf32> to vector<8x8xf32>
      %149 = arith.mulf %147, %148 : vector<8x8xf32>
      %c0_88 = arith.constant 0 : index
      %c0_89 = arith.constant 0 : index
      %150 = vector.load %arg15[%c0_88, %c0_89] : memref<8x32xf32, #tpu.memory_space<vmem>>, vector<8x8xf32>
      tpu.vector_store %arg15[%c0_88, %c0_89], %149 {strides = array<i32>} : memref<8x32xf32, #tpu.memory_space<vmem>>, vector<8x8xf32>,
      %c1_90 = arith.constant 1 : index
      %c0_91 = arith.constant 0 : index
      %c0_92 = arith.constant 0 : index
      %151 = vector.load %arg14[%c1_90, %c0_91, %c0_92] : memref<4x8x1xf32, #tpu.memory_space<vmem>>, vector<1x8x1xf32>
      %152 = vector.shape_cast %151 : vector<1x8x1xf32> to vector<8x1xf32>
      %153 = tpu.reciprocal %152 {approx = true} : vector<8x1xf32> -> vector<8x1xf32>
      %c0_93 = arith.constant 0 : index
      %c8_94 = arith.constant 8 : index
      %154 = vector.load %arg15[%c0_93, %c8_94] : memref<8x32xf32, #tpu.memory_space<vmem>>, vector<8x8xf32>
      %155 = vector.broadcast %153 : vector<8x1xf32> to vector<8x8xf32>
      %156 = arith.mulf %154, %155 : vector<8x8xf32>
      %c0_95 = arith.constant 0 : index
      %c8_96 = arith.constant 8 : index
      %157 = vector.load %arg15[%c0_95, %c8_96] : memref<8x32xf32, #tpu.memory_space<vmem>>, vector<8x8xf32>
      tpu.vector_store %arg15[%c0_95, %c8_96], %156 {strides = array<i32>} : memref<8x32xf32, #tpu.memory_space<vmem>>, vector<8x8xf32>,
      %c2_97 = arith.constant 2 : index
      %c0_98 = arith.constant 0 : index
      %c0_99 = arith.constant 0 : index
      %158 = vector.load %arg14[%c2_97, %c0_98, %c0_99] : memref<4x8x1xf32, #tpu.memory_space<vmem>>, vector<1x8x1xf32>
      %159 = vector.shape_cast %158 : vector<1x8x1xf32> to vector<8x1xf32>
      %160 = tpu.reciprocal %159 {approx = true} : vector<8x1xf32> -> vector<8x1xf32>
      %c0_100 = arith.constant 0 : index
      %c16_101 = arith.constant 16 : index
      %161 = vector.load %arg15[%c0_100, %c16_101] : memref<8x32xf32, #tpu.memory_space<vmem>>, vector<8x8xf32>
      %162 = vector.broadcast %160 : vector<8x1xf32> to vector<8x8xf32>
      %163 = arith.mulf %161, %162 : vector<8x8xf32>
      %c0_102 = arith.constant 0 : index
      %c16_103 = arith.constant 16 : index
      %164 = vector.load %arg15[%c0_102, %c16_103] : memref<8x32xf32, #tpu.memory_space<vmem>>, vector<8x8xf32>
      tpu.vector_store %arg15[%c0_102, %c16_103], %163 {strides = array<i32>} : memref<8x32xf32, #tpu.memory_space<vmem>>, vector<8x8xf32>,
      %c3_104 = arith.constant 3 : index
      %c0_105 = arith.constant 0 : index
      %c0_106 = arith.constant 0 : index
      %165 = vector.load %arg14[%c3_104, %c0_105, %c0_106] : memref<4x8x1xf32, #tpu.memory_space<vmem>>, vector<1x8x1xf32>
      %166 = vector.shape_cast %165 : vector<1x8x1xf32> to vector<8x1xf32>
      %167 = tpu.reciprocal %166 {approx = true} : vector<8x1xf32> -> vector<8x1xf32>
      %c0_107 = arith.constant 0 : index
      %c24_108 = arith.constant 24 : index
      %168 = vector.load %arg15[%c0_107, %c24_108] : memref<8x32xf32, #tpu.memory_space<vmem>>, vector<8x8xf32>
      %169 = vector.broadcast %167 : vector<8x1xf32> to vector<8x8xf32>
      %170 = arith.mulf %168, %169 : vector<8x8xf32>
      %c0_109 = arith.constant 0 : index
      %c24_110 = arith.constant 24 : index
      %171 = vector.load %arg15[%c0_109, %c24_110] : memref<8x32xf32, #tpu.memory_space<vmem>>, vector<8x8xf32>
      tpu.vector_store %arg15[%c0_109, %c24_110], %170 {strides = array<i32>} : memref<8x32xf32, #tpu.memory_space<vmem>>, vector<8x8xf32>,
      %c0_111 = arith.constant 0 : index
      %c0_112 = arith.constant 0 : index
      %172 = vector.load %arg15[%c0_111, %c0_112] : memref<8x32xf32, #tpu.memory_space<vmem>>, vector<8x32xf32>
      %c0_113 = arith.constant 0 : index
      %c0_114 = arith.constant 0 : index
      %173 = vector.load %arg9[%c0_113, %c0_114] : memref<32x32xf32, #tpu.memory_space<vmem>>, vector<32x32xf32>
      %cst_115 = arith.constant dense<0.000000e+00> : vector<8x32xf32>
      %174 = tpu.matmul %172, %173, %cst_115 {dimension_numbers = #tpu.dot_dimension_numbers<[1], [0], [0], [1], [0, 0, 1, 1], [], []>} : vector<8x32xf32>, vector<32x32xf32>, vector<8x32xf32> -> vector<8x32xf32>
      %c0_116 = arith.constant 0 : index
      %c0_117 = arith.constant 0 : index
      %175 = vector.load %arg10[%c0_116, %c0_117] : memref<1x32xf32, #tpu.memory_space<vmem>>, vector<1x32xf32>
      %176 = vector.broadcast %175 : vector<1x32xf32> to vector<8x32xf32>
      %177 = arith.addf %174, %176 : vector<8x32xf32>
      %c0_118 = arith.constant 0 : index
      %c0_119 = arith.constant 0 : index
      %c0_120 = arith.constant 0 : index
      %178 = vector.load %arg11[%c0_118, %c0_119, %c0_120] : memref<1x8x32xf32, #tpu.memory_space<vmem>>, vector<1x8x32xf32>
      %179 = vector.shape_cast %178 : vector<1x8x32xf32> to vector<8x32xf32>
      %180 = vector.shape_cast %177 : vector<8x32xf32> to vector<1x8x32xf32>
      tpu.vector_store %arg11[%c0_118, %c0_119, %c0_120], %180 {strides = array<i32>} : memref<1x8x32xf32, #tpu.memory_space<vmem>>, vector<1x8x32xf32>,
    } else {
    }
    return
  }
  func.func @transform_0(%arg0: i32, %arg1: i32, %arg2: i32) -> (i32, i32, i32) {
    %c0_i32 = arith.constant 0 : i32
    %c0_i32_0 = arith.constant 0 : i32
    return %arg0, %arg1, %c0_i32 : i32, i32, i32
  }
  func.func @transform_1(%arg0: i32, %arg1: i32, %arg2: i32) -> (i32, i32, i32) {
    %c0_i32 = arith.constant 0 : i32
    %0 = arith.cmpi eq, %arg1, %c0_i32 : i32
    %c0_i32_0 = arith.constant 0 : i32
    %1 = arith.select %0, %arg2, %c0_i32_0 : i32
    %c0_i32_1 = arith.constant 0 : i32
    %c0_i32_2 = arith.constant 0 : i32
    return %arg0, %1, %c0_i32_1 : i32, i32, i32
  }
  func.func @transform_2(%arg0: i32, %arg1: i32, %arg2: i32) -> (i32, i32, i32) {
    %c0_i32 = arith.constant 0 : i32
    %0 = arith.cmpi eq, %arg1, %c0_i32 : i32
    %c0_i32_0 = arith.constant 0 : i32
    %1 = arith.select %0, %arg2, %c0_i32_0 : i32
    %c0_i32_1 = arith.constant 0 : i32
    %c0_i32_2 = arith.constant 0 : i32
    return %arg0, %1, %c0_i32_1 : i32, i32, i32
  }
  func.func @transform_3(%arg0: i32, %arg1: i32, %arg2: i32) -> (i32, i32) {
    %c0_i32 = arith.constant 0 : i32
    %c0_i32_0 = arith.constant 0 : i32
    %c0_i32_1 = arith.constant 0 : i32
    return %c0_i32, %c0_i32_0 : i32, i32
  }
  func.func @transform_4(%arg0: i32, %arg1: i32, %arg2: i32) -> (i32, i32) {
    %c0_i32 = arith.constant 0 : i32
    %c0_i32_0 = arith.constant 0 : i32
    %c0_i32_1 = arith.constant 0 : i32
    return %c0_i32, %c0_i32_0 : i32, i32
  }
  func.func @transform_5(%arg0: i32, %arg1: i32, %arg2: i32) -> (i32, i32) {
    %c0_i32 = arith.constant 0 : i32
    %c0_i32_0 = arith.constant 0 : i32
    %c0_i32_1 = arith.constant 0 : i32
    return %c0_i32, %c0_i32_0 : i32, i32
  }
  func.func @transform_6(%arg0: i32, %arg1: i32, %arg2: i32) -> (i32, i32) {
    %c0_i32 = arith.constant 0 : i32
    %c0_i32_0 = arith.constant 0 : i32
    %c0_i32_1 = arith.constant 0 : i32
    return %c0_i32, %c0_i32_0 : i32, i32
  }
  func.func @transform_7(%arg0: i32, %arg1: i32, %arg2: i32) -> (i32, i32) {
    %c0_i32 = arith.constant 0 : i32
    %c0_i32_0 = arith.constant 0 : i32
    %c0_i32_1 = arith.constant 0 : i32
    return %c0_i32, %c0_i32_0 : i32, i32
  }
  func.func @transform_8(%arg0: i32, %arg1: i32, %arg2: i32) -> (i32, i32, i32) {
    %c0_i32 = arith.constant 0 : i32
    %c0_i32_0 = arith.constant 0 : i32
    return %arg0, %arg1, %c0_i32 : i32, i32, i32
  }
}

</mosaic_0001>

<bundles_post_ra>
// kernel: tpu_custom_call.1
= control target key start
LH: loop header
LB: loop body
LE: loop exit
PB: predicated region body
PF: predicated region fallthrough
CT: control target
= control target key end

     0   :  { %s2930_s0 = inlined_call_operand.hbm [shape: f32[2,8,32], index: 0, kind: input, shape index: {}]   ;;  %s2931_s1 = inlined_call_operand.hbm [shape: f32[2,8,32], index: 1, kind: input, shape index: {}]   ;;  %s2932_s2 = inlined_call_operand.hbm [shape: f32[2,8,32], index: 2, kind: input, shape index: {}]   ;;  %s2933_s3 = inlined_call_operand.hbm [shape: f32[32,32], index: 3, kind: input, shape index: {}]   ;;  %s2934_s4 = inlined_call_operand.hbm [shape: f32[32,32], index: 4, kind: input, shape index: {}]   ;;  %s2935_s5 = inlined_call_operand.hbm [shape: f32[32,32], index: 5, kind: input, shape index: {}]   ;;  %s2936_s6 = inlined_call_operand.hbm [shape: f32[32,32], index: 6, kind: input, shape index: {}]   ;;  %s2937_s7 = inlined_call_operand.vmem [shape: f32[1,32], index: 7, kind: input, shape index: {}]   ;;  %s2938_s8 = inlined_call_operand.hbm [shape: f32[2,8,32], index: 8, kind: output, shape index: {}]  }
   0x1   :  { %2954 = sst [smem:[#allocation32_spill]] %s2931_s1 }
   0x2   :  { %2955 = sst [smem:[#allocation33_spill]] %s2933_s3 }
   0x3   :  { %2956 = sst [smem:[#allocation34_spill]] %s2934_s4 }
   0x4   :  { %2957 = sst [smem:[#allocation35_spill]] %s2935_s5 }
   0x5   :  { %13 = vsyncpa [#allocation9], 0 }
   0x6   :  { %15 = vsyncpa [#allocation9 + $0x1], 0 }
   0x7   :  { %16 = vsyncpa [#allocation12], 0 }
   0x8   :  { %18 = vsyncpa [#allocation12 + $0x1], 0 }
   0x9   :  { %19 = vsyncpa [#allocation15], 0 }
   0xa   :  { %20 = vsyncpa [#allocation18], 0 }
   0xb   :  { %21 = vsyncpa [#allocation10], 0 }
   0xc   :  { %23 = vsyncpa [#allocation10 + $0x1], 0  ;;  %s2511_s27 = smov 0   ;;  %s2513_s28 = smov 0  }
   0xd   :  { %s2515_s29 = smov 0   ;;  %s2517_s30 = smov 0  }
   0xe   :  { %s2519_s9 = smov 0   ;;  %s2521_s10 = smov 0  }
   0xf LB: > { %2958 = sst [smem:[#allocation26_spill]] %s2424_s27  ;;  %s2542_s11 = sadd.s32 4294967295, %s2444_s10   ;;  %s2444_s10 = sphi %s2521_s10, %s29_s10   ;;  %s2440_s9 = sphi %s2519_s9, %s2994_s9   ;;  %s2436_s30 = sphi %s2517_s30, %s2993_s30   ;;  %s2432_s29 = sphi %s2515_s29, %s2997_s29   ;;  %s2428_s28 = sphi %s2513_s28, %s2996_s28   ;;  %s2424_s27 = sphi %s2511_s27, %s2995_s27  }
  0x10   : > { %2959 = sst [smem:[#allocation27_spill]] %s2440_s9  ;;  %p1851_p0 = scmp.ge.s32.totalorder %s2444_s10, 1 }
  0x11   : > { %2960 = sst [smem:[#allocation28_spill]] %s2444_s10  ;;  %p2948_p1 = scmp.eq.s32.totalorder %s2542_s11, 0 }
  0x12   : > { %p278_p2 = scmp.lt.s32.totalorder %s2444_s10, 3  ;;  %s2446_s13 = smov [#allocation14]  }
  0x13   : > { %s290_s14 = sshll.u32 %s2446_s13, 4  ;;  %s2447_s16 = smov [#allocation17]   ;;  %s291_s14 = int_to_ptr.vmem [resolvable:$true] %s290_s14 }
  0x14   : > { %p2547_p3 = pnand %p1851_p0, %p278_p2  ;;  %s316_s17 = sshll.u32 %s2447_s16, 4  ;;  %s317_s17 = int_to_ptr.vmem [resolvable:$true] %s316_s17 }
  0x15   : > { %s2175_s18 = scalar_lea.vmem %s291_s14, 512  ;;  %p2183_p11 = scmp.lt.s32.totalorder %s291_s14, %s291_s14 }
  0x16   : > { %p2037_p4 = pneg %p2547_p3  ;;  %p2176_p8 = scmp.ne.s32.totalorder %s291_s14, %s2175_s18 }
  0x17   : > { %p2184_p12 = scmp.lt.s32.totalorder %s2175_s18, %s2175_s18 }
  0x18   : > { %p2556_p6 = pnand %p2037_p4, %p2948_p1 }
  0x19   : > { %p2185_p13 = por %p2184_p12, %p2183_p11 }
  0x1a   : > { %p2949_p7 = pneg %p2556_p6 }
  0x1c   : > { %p2178_p9 = pnand %p2176_p8, %p2949_p7 }
  0x1e   : > { %p2179_p10 = pneg %p2178_p9 }
  0x20   : > { %p2186_p0 = pnand %p2185_p13, %p2179_p10 }
  0x22   : > { %2189 = shalt.err (!%p2186_p0)
}
  0x23   : > { %s2939_s19 = smov 128   ;;  %s2941_s20 = smov 8  }
  0x24   : > { %s2963_s3 = sld [smem:[#allocation33_spill]]  ;;  %s2201_s23 = scalar_lea.vmem %s317_s17, 512 }
  0x25   : > { %p2202_p2 = scmp.ne.s32.totalorder %s317_s17, %s2201_s23  ;;  %p2209_p9 = scmp.lt.s32.totalorder %s317_s17, %s317_s17 }
  0x26   : > { %p2210_p10 = scmp.lt.s32.totalorder %s2201_s23, %s2201_s23 }
  0x27   : > { %p2204_p4 = pnand %p2202_p2, %p2949_p7 }
  0x28   : > { %p2211_p11 = por %p2210_p10, %p2209_p9 }
  0x29   : > { %p2205_p8 = pneg %p2204_p4 }
  0x2a   : > { %2040 = dma.hbm_to_vmem [thread:$0]  (!%p2556_p6), %s2963_s3, 512, %s291_s14, [#allocation15], %s2939_s19, %s2939_s19, %s2941_s20  }
  0x2b   : > { %p2212_p12 = pnand %p2211_p11, %p2205_p8 }
  0x2d   : > { %2215 = shalt.err (!%p2212_p12)
}
  0x2e   : > { %s2964_s5 = sld [smem:[#allocation35_spill]]  ;;  %s1850_s26 = sadd.s32 4294967294, %s2444_s10  }
  0x2f   : > { %s48_s13 = sadd.s32 1, %s2440_s9  ;;  %s57_s14 = sadd.s32 1, %s2432_s29 }
  0x30   : > { %p50_p13 = scmp.ge.s32.totalorder %s48_s13, 2  ;;  %p64_p0 = scmp.ne.s32.totalorder %s2432_s29, %s2428_s28 }
  0x31   : > { %p65_p2 = scmp.eq.s32.totalorder %s2444_s10, 0  ;;  %p70_p8 = scmp.ne.s32.totalorder %s2428_s28, %s2424_s27 }
  0x32   : > { %s2999_s13 = smov (%p50_p13, %s48_s13), 0  ;;  %p265_p9 = scmp.eq.s32.totalorder %s2542_s11, 1 }
  0x33   : > { %2965 = sst [smem:[#allocation29_spill]] %s2999_s13  ;;  %p2592_p4 = por %p65_p2, %p64_p0 }
  0x34   : > { %2046 = dma.hbm_to_vmem [thread:$0]  (!%p2556_p6), %s2964_s5, 512, %s317_s17, [#allocation18], %s2939_s19, %s2939_s19, %s2941_s20  }
  0x35   : > { %s52_s17 = ssub.s32 %s2440_s9, %s2999_s13  ;;  %p2603_p11 = por %p2948_p1, %p70_p8 }
  0x36   : > { %p55_p10 = scmp.eq.s32.totalorder %s52_s17, 0  ;;  %p2607_p12 = por %p265_p9, %p64_p0 }
  0x37   : > { %p271_p13 = scmp.eq.s32.totalorder %s1850_s26, 1  ;;  %p2068_p5 = scmp.lt.s32.totalorder %s2444_s10, 2 }
  0x38   : > { %s2968_s21 = scalar_select %p2607_p12, 1, 0 }
  0x39   : > { %s2612_s22 = scalar_select %p55_p10, %s2432_s29, %s57_s14  }
  0x3a   : > { %p2614_p2 = por %p271_p13, %p70_p8  ;;  %s2945_s24 = sand.u32 1, %s2432_s29  }
  0x3b   : > { %2969 = sst [smem:[#allocation30_spill]] %s2612_s22  ;;  %s2621_s25 = sshll.u32 %s2440_s9, 7 }
  0x3c   : > { %s2970_s23 = scalar_select %p2614_p2, 1, 0 }
  0x3d   : > { %s2625_s17 = sshll.u32 %s2945_s24, 3  ;;  %p2629_p0 = pnand %p2068_p5, %p2592_p4 }
  0x3e   : > { %2971 = sst [smem:[#allocation31_spill]] %s2970_s23  ;;  %s365_s26 = sand.u32 1, %s2444_s10  }
  0x3f   : > { %s2973_s1 = sld [smem:[#allocation32_spill]]  ;;  %s369_s5 = scalar_lea.vmem [#allocation11], %s2625_s17 }
  0x40   : > { %s379_s13 = sshll.u32 %s369_s5, 4  ;;  %s2639_s9 = scalar_lea.sflag [#allocation12], %s365_s26  ;;  %s380_s13 = int_to_ptr.vmem [resolvable:$true] %s379_s13 }
  0x41   : > { %p2950_p8 = pneg %p2629_p0  ;;  %s2229_s16 = scalar_lea.vmem %s380_s13, 128 }
  0x42   : > { %p2230_p9 = scmp.ne.s32.totalorder %s380_s13, %s2229_s16  ;;  %s2450_s24 = smov [#allocation11]  }
  0x43   : > { %s2234_s22 = sshll.u32 %s2450_s24, 4  ;;  %s2235_s22 = int_to_ptr.vmem [resolvable:$false] %s2234_s22 }
  0x44   : > { %p2232_p5 = pnand %p2230_p9, %p2950_p8  ;;  %s2236_s10 = scalar_lea.vmem %s2235_s22, 256 }
  0x45   : > { %s377_s3 = scalar_lea.hbm %s2973_s1, %s2621_s25  ;;  %p2237_p10 = scmp.lt.s32.totalorder %s380_s13, %s2235_s22 }
  0x46   : > { %p2233_p4 = pneg %p2232_p5  ;;  %p2238_p13 = scmp.lt.s32.totalorder %s2236_s10, %s2229_s16 }
  0x48   : > { %p2239_p1 = por %p2238_p13, %p2237_p10 }
  0x4a   : > { %p2240_p7 = pnand %p2239_p1, %p2233_p4 }
  0x4c   : > { %2243 = shalt.err (!%p2240_p7)
}
  0x4d   : > { %2056 = dma.hbm_to_vmem [thread:$0]  (!%p2629_p0), %s377_s3, 128, %s380_s13, %s2639_s9  }
  0x4e   : > { %s2451_s5 = smov [#allocation16]   ;;  %s2452_s26 = smov [#allocation19]  }
  0x4f   : > { %s303_s20 = sshll.u32 %s2451_s5, 4  ;;  %s329_s14 = sshll.u32 %s2452_s26, 4  ;;  %s304_s20 = int_to_ptr.vmem [resolvable:$true] %s303_s20  ;;  %s330_s14 = int_to_ptr.vmem [resolvable:$true] %s329_s14 }
  0x50   : > { %s2255_s1 = scalar_lea.vmem %s304_s20, 512  ;;  %p2974_p5 = pneg %p2556_p6 }
  0x51   : > { %p2256_p9 = scmp.ne.s32.totalorder %s304_s20, %s2255_s1  ;;  %p2263_p12 = scmp.lt.s32.totalorder %s304_s20, %s304_s20 }
  0x52   : > { %p2264_p10 = scmp.lt.s32.totalorder %s2255_s1, %s2255_s1 }
  0x53   : > { %p2258_p8 = pnand %p2256_p9, %p2974_p5 }
  0x54   : > { %p2265_p1 = por %p2264_p10, %p2263_p12 }
  0x55   : > { %p2259_p2 = pneg %p2258_p8 }
  0x57   : > { %p2266_p7 = pnand %p2265_p1, %p2259_p2 }
  0x59   : > { %2269 = shalt.err (!%p2266_p7)
}
  0x5a   : > { %s2975_s10 = smov 8   ;;  %s2976_s3 = smov 128  }
  0x5b   : > { %s2977_s4 = sld [smem:[#allocation34_spill]]  ;;  %s2281_s24 = scalar_lea.vmem %s330_s14, 512 }
  0x5c   : > { %p2282_p4 = scmp.ne.s32.totalorder %s330_s14, %s2281_s24  ;;  %p2978_p8 = pmov %p2974_p5 }
  0x5d   : > { %p2289_p12 = scmp.lt.s32.totalorder %s330_s14, %s330_s14  ;;  %p2290_p2 = scmp.lt.s32.totalorder %s2281_s24, %s2281_s24 }
  0x5e   : > { %p2284_p13 = pnand %p2282_p4, %p2978_p8 }
  0x5f   : > { %p2291_p5 = por %p2290_p2, %p2289_p12 }
  0x60   : > { %p2285_p9 = pneg %p2284_p13 }
  0x61   : > { %2043 = dma.hbm_to_vmem [thread:$0]  (!%p2556_p6), %s2977_s4, 512, %s304_s20, [#allocation15], %s2976_s3, %s2976_s3, %s2975_s10  }
  0x62   : > { %p2292_p10 = pnand %p2291_p5, %p2285_p9 }
  0x64   : > { %2295 = shalt.err (!%p2292_p10)
}
  0x65   : > { %2049 = dma.hbm_to_vmem [thread:$0]  (!%p2556_p6), %s2936_s6, 512, %s330_s14, [#allocation18], %s2976_s3, %s2976_s3, %s2975_s10  }
  0x66   : > { %s356_s26 = scalar_lea.hbm %s2930_s0, %s2621_s25  ;;  %s350_s13 = scalar_lea.vmem [#allocation8], %s2625_s17 }
  0x67   : > { %s358_s22 = sshll.u32 %s350_s13, 4  ;;  %s398_s4 = scalar_lea.hbm %s2932_s2, %s2621_s25  ;;  %s359_s22 = int_to_ptr.vmem [resolvable:$true] %s358_s22 }
  0x68   : > { %s2979_s23 = sand.u32 1, %s2432_s29   ;;  %s2309_s1 = scalar_lea.vmem %s359_s22, 128 }
  0x69   : > { %s347_s27 = scalar_lea.sflag [#allocation9], %s2979_s23  ;;  %p2310_p1 = scmp.ne.s32.totalorder %s359_s22, %s2309_s1 }
  0x6a   : > { %p2980_p7 = pneg %p2629_p0  ;;  %s2453_s14 = smov [#allocation8]  }
  0x6b   : > { %s2314_s10 = sshll.u32 %s2453_s14, 4  ;;  %s2315_s10 = int_to_ptr.vmem [resolvable:$false] %s2314_s10 }
  0x6c   : > { %p2312_p4 = pnand %p2310_p1, %p2980_p7  ;;  %s2316_s3 = scalar_lea.vmem %s2315_s10, 256 }
  0x6d   : > { %p2317_p6 = scmp.lt.s32.totalorder %s359_s22, %s2315_s10  ;;  %p2318_p13 = scmp.lt.s32.totalorder %s2316_s3, %s2309_s1 }
  0x6e   : > { %p2313_p8 = pneg %p2312_p4 }
  0x6f   : > { %p2319_p9 = por %p2318_p13, %p2317_p6 }
  0x71   : > { %p2320_p12 = pnand %p2319_p9, %p2313_p8 }
  0x73   : > { %2323 = shalt.err (!%p2320_p12)
}
  0x74   : > { %2053 = dma.hbm_to_vmem [thread:$0]  (!%p2629_p0), %s356_s26, 128, %s359_s22, %s347_s27  }
  0x75   : > { %s390_s23 = scalar_lea.vmem [#allocation13], %s2625_s17  ;;  %p2981_p5 = pmov %p2980_p7 }
  0x76   : > { %s400_s16 = sshll.u32 %s390_s23, 4  ;;  %s2454_s20 = smov [#allocation13]   ;;  %s401_s16 = int_to_ptr.vmem [resolvable:$true] %s400_s16 }
  0x77   : > { %s2337_s5 = scalar_lea.vmem %s401_s16, 128  ;;  %s2342_s13 = sshll.u32 %s2454_s20, 4  ;;  %s2343_s13 = int_to_ptr.vmem [resolvable:$false] %s2342_s13 }
  0x78   : > { %p2338_p2 = scmp.ne.s32.totalorder %s401_s16, %s2337_s5  ;;  %s2344_s15 = scalar_lea.vmem %s2343_s13, 256 }
  0x79   : > { %p2345_p7 = scmp.lt.s32.totalorder %s401_s16, %s2343_s13  ;;  %p2346_p4 = scmp.lt.s32.totalorder %s2344_s15, %s2337_s5 }
  0x7a   : > { %p2340_p10 = pnand %p2338_p2, %p2981_p5 }
  0x7b   : > { %p2347_p8 = por %p2346_p4, %p2345_p7 }
  0x7c   : > { %p2341_p1 = pneg %p2340_p10 }
  0x7e   : > { %p2348_p6 = pnand %p2347_p8, %p2341_p1 }
  0x80   : > { %2351 = shalt.err (!%p2348_p6)
}
  0x81   : > { %2059 = dma.hbm_to_vmem [thread:$0]  (!%p2629_p0), %s398_s4, 128, %s401_s16, %s2639_s9  }
  0x82   : > { %409 = sbr.rel (%p2547_p3) target bundleno = 1906 (0x772), region = 52  ;;  %s2702_s26 = sand.u32 (!%p2547_p3), 1, %s2428_s28  }
  0x83   : > { %s2705_s22 = sshll.u32 (!%p2547_p3), %s2702_s26, 3  ;;  %s412_s19 = scalar_lea.sflag (!%p2547_p3), [#allocation9], %s2702_s26 }
  0x84   : > { %s415_s24 = scalar_lea.vmem (!%p2547_p3), [#allocation8], %s2705_s22 }
  0x87   : > { %2403 = dma.done.wait (%p2603_p11), %s412_s19, 128  }
  0x88   : > { %2405 = vsyncadd (%p2603_p11), %s412_s19, 4294967168  ;;  %s420_s4 = sand.u32 1, %s2542_s11   ;;  %s424_s12 = scalar_lea.vmem [#allocation11], %s2705_s22 }
  0x89   : > { %s421_s9 = scalar_lea.sflag [#allocation12], %s420_s4 }
  0x8a   : > { %2407 = dma.done.wait (%p2603_p11), %s421_s9, 256  }
  0x8b   : > { %2409 = vsyncadd (%p2603_p11), %s421_s9, 4294967040  ;;  %s433_s25 = scalar_lea.vmem [#allocation13], %s2705_s22  ;;  %p2982_p3 = scmp.eq.s32.totalorder %s2542_s11, 0 }
  0x8d   : > { %2411 = dma.done.wait (%p2982_p3), [#allocation15], 1024   ;;  %p2983_p0 = pmov %p2982_p3 }
  0x8f   : > { %2413 = vsyncadd (%p2983_p0), [#allocation15], 4294966272  ;;  %p2984_p13 = pmov %p2983_p0 }
  0x90   : > { %p2985_p9 = pmov %p2983_p0 }
  0x91   : > { %2415 = dma.done.wait (%p2984_p13), [#allocation18], 1024  }
  0x92   : > { %2417 = vsyncadd (%p2985_p9), [#allocation18], 4294966272  ;;  %vm505_vm0 = vcmask 261120   ;;  %v2455_v0 = vmov 0.0   ;;  %vm2456_vm1 = vmmov 0   ;;  %v504_v1 = vld [vmem:[#allocation14 + $0x18] sm:$0xff] }
  0x93   : > { %1929 = vmatprep.subr.mxu0 %v2455_v0  ;;  %1940 = vmatprep.subr.mxu1 %v2455_v0  ;;  %590 = vst.msk [vmem:[#allocation5] sm:$0xff] %vm505_vm0, %v2455_v0  ;;  %v599_v2 = vld [vmem:[#allocation16 + $0x18] sm:$0xff]  ;;  %v503_v3 = vld [vmem:[#allocation14 + $0x10] sm:$0xff]  ;;  %v502_v5 = vld [vmem:[#allocation14 + $0x8] sm:$0xff]  ;;  %vm763_vm2 = vcmask 64512   ;;  %s2457_s11 = smov 120  }
  0x94   : > { %1937 = vmatprep.mubr.msk.f32.mxu0 %vm2456_vm1, %v2455_v0  ;;  %1948 = vmatprep.mubr.msk.f32.mxu1 %vm2456_vm1, %v2455_v0  ;;  %v598_v4 = vld [vmem:[#allocation16 + $0x10] sm:$0xff]  ;;  %v597_v6 = vld [vmem:[#allocation16 + $0x8] sm:$0xff]  ;;  %v501_v7 = vld [vmem:[#allocation14] sm:$0xff]  ;;  %s2458_s18 = smov 112   ;;  %s2459_s1 = smov 104   ;;  %vm581_vm3 = vcmask 7168  }
  0x95   : > { %1930 = vmatpush3.msra.mxu0 %v504_v1  ;;  %1941 = vmatpush3.msra.mxu1 %v599_v2  ;;  %v596_v8 = vld [vmem:[#allocation16] sm:$0xff]  ;;  %v500_v9 = vld [vmem:[%s415_s24] sm:$0xff]  ;;  %v679_v13 = vld [vmem:[#allocation17 + $0x8] sm:$0xff]  ;;  %v2460_v34 = vmov -inf   ;;  %586 = vst.msk [vmem:[#allocation4] sm:$0xff] %vm581_vm3, %v2455_v0  ;;  %v2461_v35 = vmov 0  }
  0x96   : > { %1931 = vmatprep.subr.mxu0 %v2455_v0  ;;  %1942 = vmatprep.subr.mxu1 %v2455_v0  ;;  %v595_v10 = vld [vmem:[%s424_s12] sm:$0xff]  ;;  %v681_v11 = vld [vmem:[#allocation17 + $0x18] sm:$0xff]  ;;  %v680_v12 = vld [vmem:[#allocation17 + $0x10] sm:$0xff]  ;;  %582 = vst.msk [vmem:[#allocation3] sm:$0xff] %vm581_vm3, %v2460_v34  ;;  %s2462_s14 = smov 8   ;;  %s2463_s10 = smov 16  }
  0x97   : > { %1932 = vmatpush3.msra.mxu0 %v503_v3  ;;  %1943 = vmatpush3.msra.mxu1 %v598_v4  ;;  %v678_v14 = vld [vmem:[#allocation17] sm:$0xff]  ;;  %v677_v20 = vld [vmem:[%s433_s25] sm:$0xff]  ;;  %583 = vst.msk [vmem:[#allocation3 + $0x8] sm:$0xff] %vm581_vm3, %v2460_v34  ;;  %584 = vst.msk [vmem:[#allocation3 + $0x10] sm:$0xff] %vm581_vm3, %v2460_v34  ;;  %s2464_s3 = smov 24   ;;  %vm1140_vm4 = vcmask 130112  }
  0x98   : > { %1933 = vmatprep.subr.mxu0 %v2455_v0  ;;  %1944 = vmatprep.subr.mxu1 %v2455_v0  ;;  %585 = vst.msk [vmem:[#allocation3 + $0x18] sm:$0xff] %vm581_vm3, %v2460_v34  ;;  %587 = vst.msk [vmem:[#allocation4 + $0x8] sm:$0xff] %vm581_vm3, %v2455_v0  ;;  %vm1334_vm5 = vcmask 195712   ;;  %vm1528_vm6 = vcmask 261312   ;;  %s1890_s5 = sshll.u32 %s2436_s30, 7  ;;  %s491_s20 = scalar_lea.vmem [#allocation20], %s2705_s22 }
  0x99   : > { %1934 = vmatpush3.msra.mxu0 %v502_v5  ;;  %1945 = vmatpush3.msra.mxu1 %v597_v6  ;;  %588 = vst.msk [vmem:[#allocation4 + $0x10] sm:$0xff] %vm581_vm3, %v2455_v0  ;;  %589 = vst.msk [vmem:[#allocation4 + $0x18] sm:$0xff] %vm581_vm3, %v2455_v0  ;;  %s1675_s13 = sshll.u32 %s491_s20, 4  ;;  %s2887_s17 = scalar_lea.hbm %s2938_s8, %s1890_s5  ;;  %s1676_s13 = int_to_ptr.vmem [resolvable:$true] %s1675_s13 }
  0x9a   : > { %1935 = vmatprep.subr.mxu0 %v2455_v0  ;;  %1946 = vmatprep.subr.mxu1 %v2455_v0  ;;  %s1661_s19 = scalar_lea.sflag [#allocation10], %s2702_s26  ;;  %s2352_s24 = scalar_lea.vmem %s1676_s13, 128 }
  0x9b   : > { %1936 = vmatpush3.msra.mxu0 %v501_v7  ;;  %1947 = vmatpush3.msra.mxu1 %v596_v8  ;;  %p2353_p11 = scmp.ne.s32.totalorder %s1676_s13, %s2352_s24  ;;  %p2986_p12 = scmp.ne.s32.totalorder %s2968_s21, 0 }
  0x9c   : > { %1938 = vmatmul.mubr.msk.f32.vlgmr.msra.gmra.mxu0 %vm505_vm0, %v500_v9  ;;  %1949 = vmatmul.mubr.msk.f32.vlgmr.msra.gmra.mxu1 %vm505_vm0, %v595_v10  ;;  %s2465_s30 = smov [#allocation20]  }
  0x9d   : > { %1962 = vmatprep.subr.mxu1 %v2455_v0  ;;  %1964 = vmatprep.mubr.msk.f32.mxu1 %vm2456_vm1, %v2455_v0  ;;  %v2802_v40 = vld [vmem:[#allocation3] sm:$0xff]  ;;  %p2354_p2 = pnand %p2353_p11, %p2986_p12  ;;  %s2356_s22 = sshll.u32 %s2465_s30, 4  ;;  %s2357_s22 = int_to_ptr.vmem [resolvable:$false] %s2356_s22 }
  0x9e   : > { %1951 = vmatprep.subr.mxu0 %v2455_v0  ;;  %1959 = vmatprep.mubr.msk.f32.mxu0 %vm2456_vm1, %v2455_v0  ;;  %v2822_v50 = vld [vmem:[#allocation3 + $0x10] sm:$0xff]  ;;  %v1026_v60 = vld [vmem:[#allocation3 + $0x8] sm:$0xff]  ;;  %s2358_s4 = scalar_lea.vmem %s2357_s22, 256  ;;  %p2359_p10 = scmp.lt.s32.totalorder %s1676_s13, %s2357_s22 }
  0x9f   : > { %1952 = vmatpush3.msra.mxu0 %v681_v11  ;;  %2138 = vset.pattern.permute.xlu0 %v2461_v35  ;;  %v1415_v63 = vld [vmem:[#allocation3 + $0x18] sm:$0xff]  ;;  %p2355_p5 = pneg %p2354_p2  ;;  %p2360_p1 = scmp.lt.s32.totalorder %s2358_s4, %s2352_s24 }
  0xa0   : > { %1953 = vmatprep.subr.mxu0 %v2455_v0  ;;  %2139 = vset.pattern.permute.xlu1 %v2461_v35 }
  0xa1   : > { %1954 = vmatpush3.msra.mxu0 %v680_v12  ;;  %p2361_p7 = por %p2360_p1, %p2359_p10 }
  0xa2   : > { %1955 = vmatprep.subr.mxu0 %v2455_v0 }
  0xa3   : > { %1956 = vmatpush3.msra.mxu0 %v679_v13  ;;  %p2362_p4 = pnand %p2361_p7, %p2355_p5 }
  0xa4   : > { %1957 = vmatprep.subr.mxu0 %v2455_v0 }
  0xa5   : > { %1958 = vmatpush3.msra.mxu0 %v678_v14 }
  0xa6   : > { %1982 = vmatprep.subr.mxu0 %v2455_v0  ;;  %1960 = vmatmul.mubr.msk.f32.vlgmr.msra.gmra.mxu0 %vm505_vm0, %v677_v20 }
  0xa7   : > { %1984 = vmatprep.mubr.msk.f32.mxu0 %vm2456_vm1, %v2455_v0 }
 0x15c   : > { %v575_v15 = vpop.f32.mrf.mxu0  ;;  %v670_v16 = vpop.f32.mrf.mxu1 }
 0x15d   : > { %v579_v17 = vmul.f32 0.35355338, %v575_v15  ;;  %676 = vst.msk [vmem:[#allocation6] sm:$0xff] %vm505_vm0, %v670_v16 }
 0x15e   : > { %v1939_v18 = vpop.f32.mrf.mxu0  ;;  %v1950_v19 = vpop.f32.mrf.mxu1 }
 0x15f   : > { %580 = vst.msk [vmem:[#allocation2] sm:$0xff] %vm505_vm0, %v579_v17 }
 0x164   : > { %v759_v21 = vld [vmem:[#allocation6] sm:$0xff] }
 0x165   : > { %949 = vrot.lane.b32.xlu1 %v759_v21, %s2457_s11  ;;  %1963 = vmatpush3.xpose.msk.msra.mxu1 %vm763_vm2, %v759_v21 }
 0x166   : > { %v762_v22 = vld [vmem:[#allocation2] sm:$0xff]  ;;  %1967 = vmatprep.subr.mxu1 %v2455_v0  ;;  %v751_v29 = vpop.f32.mrf.mxu0 }
 0x167   : > { %756 = vst.msk [vmem:[#allocation7] sm:$0xff] %vm505_vm0, %v751_v29 }
 0x168   : > { %1965 = vmatmul.mubr.msk.f32.vlgmr.msra.gmra.mxu1 %vm763_vm2, %v762_v22  ;;  %v1961_v30 = vpop.f32.mrf.mxu0 }
 0x169   : > { %947 = vrot.lane.b32.xlu1 %v762_v22, %s2457_s11  ;;  %1969 = vmatprep.mubr.msk.f32.mxu1 %vm2456_vm1, %v2455_v0 }
 0x16d   : > { %1144 = vrot.lane.b32.xlu1 %v759_v21, %s2458_s18 }
 0x16e   : > { %v761_v44 = vld [vmem:[#allocation7] sm:$0xff] }
 0x16f   : > { %1968 = vmatpush3.msra.mxu1 %v761_v44 }
 0x170   : > { %1972 = vmatprep.subr.mxu1 %v2455_v0 }
 0x171   : > { %1142 = vrot.lane.b32.xlu1 %v762_v22, %s2458_s18 }
 0x175   : > { %1338 = vrot.lane.b32.xlu1 %v759_v21, %s2459_s1 }
 0x179   : > { %1336 = vrot.lane.b32.xlu1 %v762_v22, %s2459_s1 }
 0x1d7   : > { %v950_v23 = vpop.permute.xlu1 %949 }
 0x1db   : > { %v948_v24 = vpop.permute.xlu1 %947 }
 0x1df   : > { %v1145_v25 = vpop.permute.xlu1 %1144 }
 0x1e0   : > { %1983 = vmatpush3.xpose.msk.msra.mxu0 %vm763_vm2, %v1145_v25 }
 0x1e1   : > { %1992 = vmatprep.subr.mxu0 %v2455_v0 }
 0x1e3   : > { %v1143_v26 = vpop.permute.xlu1 %1142 }
 0x1e4   : > { %1985 = vmatmul.mubr.msk.f32.vlgmr.msra.gmra.mxu0 %vm763_vm2, %v1143_v26 }
 0x1e5   : > { %1994 = vmatprep.mubr.msk.f32.mxu0 %vm2456_vm1, %v2455_v0 }
 0x1e7   : > { %v1339_v27 = vpop.permute.xlu1 %1338 }
 0x1e8   : > { %1993 = vmatpush3.xpose.msk.msra.mxu0 %vm763_vm2, %v1339_v27 }
 0x1e9   : > { %2002 = vmatprep.subr.mxu0 %v2455_v0 }
 0x1eb   : > { %v1337_v28 = vpop.permute.xlu1 %1336 }
 0x1ec   : > { %1995 = vmatmul.mubr.msk.f32.vlgmr.msra.gmra.mxu0 %vm763_vm2, %v1337_v28 }
 0x1ed   : > { %2010 = vmatprep.mubr.msk.f32.mxu0 %vm2456_vm1, %v2455_v0 }
 0x228   : > { %v836_v31 = vpop.f32.mrf.mxu1 }
 0x229   : > { %v841_v32 = vsel %vm763_vm2, %v836_v31, -inf }
 0x22a   : > { %842 = vmax.xlane.f32.xlu0 %v841_v32  ;;  %v1966_v33 = vpop.f32.mrf.mxu1  ;;  %v856_v32 = vld [vmem:[#allocation4] sm:$0xff] }
 0x2a4   : > { %v1216_v36 = vpop.f32.mrf.mxu0 }
 0x2a5   : > { %v1222_v45 = vsel %vm763_vm2, %v1216_v36, -inf }
 0x2a6   : > { %v1986_v37 = vpop.f32.mrf.mxu0 }
 0x2ac   : > { %v2800_v38 = vpop.f32.mrf.mxu0 }
 0x2ad   : > { %v1416_v59 = vsel %vm763_vm2, %v2800_v38, -inf }
 0x2ae   : > { %v1996_v39 = vpop.f32.mrf.mxu0 }
 0x2b3   : > { %v843_v41 = vpop.xlane.xlu0 %842 }
 0x2b4   : > { %v2805_v42 = vmax.f32 %v2802_v40, %v843_v41  ;;  %v1238_v41 = vld [vmem:[#allocation4 + $0x10] sm:$0xff] }
 0x2b6   : > { %v845_v43 = vsub.f32 %v2802_v40, %v2805_v42  ;;  %864 = vst.msk [vmem:[#allocation3] sm:$0xff] %vm581_vm3, %v2805_v42  ;;  %850 = vperm.xlu0 %2138, %v2805_v42  }
 0x2b8   : > { %v846_v25 = vmul.f32 1.442695, %v845_v43 }
 0x2d5   : > { %1223 = vmax.xlane.f32.xlu0 %v1222_v45  ;;  %v1432_v45 = vld [vmem:[#allocation4 + $0x18] sm:$0xff] }
 0x331   : > { %v851_v46 = vpop.permute.xlu0 %850 }
 0x332   : > { %v853_v47 = vsub.f32 %v836_v31, %v851_v46 }
 0x334   : > { %v854_v48 = vmul.f32 1.442695, %v853_v47 }
 0x336   : > { %2140 = vpow2.f32 %v854_v48 }
 0x343   : > { %v2141_v49 = vpop.eup %2140 }
 0x344   : > { %1970 = vmatmul.mubr.msk.f32.vlgmr.msra.gmra.mxu1 %vm763_vm2, %v2141_v49  ;;  %v858_v5 = vsel %vm763_vm2, %v2141_v49, 0.0 }
 0x345   : > { %1973 = vmatpush3.xpose.msk.msra.mxu1 %vm763_vm2, %v950_v23  ;;  %1974 = vmatprep.mubr.msk.f32.mxu1 %vm2456_vm1, %v2455_v0 }
 0x346   : > { %1977 = vmatprep.subr.mxu1 %v2455_v0 }
 0x348   : > { %1975 = vmatmul.mubr.msk.f32.vlgmr.msra.gmra.mxu1 %vm763_vm2, %v948_v24 }
 0x349   : > { %1979 = vmatprep.mubr.msk.f32.mxu1 %vm2456_vm1, %v2455_v0 }
 0x35e   : > { %v1224_v51 = vpop.xlane.xlu0 %1223 }
 0x35f   : > { %v2825_v52 = vmax.f32 %v2822_v50, %v1224_v51 }
 0x361   : > { %v1226_v53 = vsub.f32 %v2822_v50, %v2825_v52  ;;  %1245 = vst.msk [vmem:[#allocation3 + $0x10] sm:$0xff] %vm581_vm3, %v2825_v52  ;;  %1231 = vperm.xlu0 %2138, %v2825_v52   ;;  %v865_v50 = vld [vmem:[#allocation5] sm:$0xff] }
 0x363   : > { %v1227_v26 = vmul.f32 1.442695, %v1226_v53 }
 0x3dc   : > { %v1232_v6 = vpop.permute.xlu0 %1231 }
 0x3dd   : > { %v1234_v7 = vsub.f32 %v1216_v36, %v1232_v6  ;;  %v1574_v6 = vld [vmem:[#allocation19] sm:$0xff] }
 0x3df   : > { %v1235_v10 = vmul.f32 1.442695, %v1234_v7 }
 0x404   : > { %v2832_v54 = vpop.f32.mrf.mxu1 }
 0x406   : > { %v1971_v55 = vpop.f32.mrf.mxu1 }
 0x408   : > { %v1021_v56 = vpop.f32.mrf.mxu1 }
 0x409   : > { %v1027_v57 = vsel %vm763_vm2, %v1021_v56, -inf }
 0x40a   : > { %1028 = vmax.xlane.f32.xlu1 %v1027_v57  ;;  %v1976_v58 = vpop.f32.mrf.mxu1 }
 0x40e   : > { %1417 = vmax.xlane.f32.xlu1 %v1416_v59 }
 0x493   : > { %v1029_v61 = vpop.xlane.xlu1 %1028 }
 0x494   : > { %v1030_v62 = vmax.f32 %v1026_v60, %v1029_v61 }
 0x496   : > { %v1031_v1 = vsub.f32 %v1026_v60, %v1030_v62  ;;  %1050 = vst.msk [vmem:[#allocation3 + $0x8] sm:$0xff] %vm581_vm3, %v1030_v62  ;;  %1036 = vperm.xlu1 %2139, %v1030_v62  }
 0x497   : > { %v1418_v2 = vpop.xlane.xlu1 %1417 }
 0x498   : > { %v1419_v3 = vmax.f32 %v1415_v63, %v1418_v2  ;;  %v1032_v23 = vmul.f32 1.442695, %v1031_v1 }
 0x49a   : > { %v1420_v4 = vsub.f32 %v1415_v63, %v1419_v3  ;;  %1439 = vst.msk [vmem:[#allocation3 + $0x18] sm:$0xff] %vm581_vm3, %v1419_v3  ;;  %1059 = vrot.lane.b32.xlu1 %v761_v44, %s2457_s11 }
 0x49c   : > { %v1421_v27 = vmul.f32 1.442695, %v1420_v4  ;;  %v1576_v4 = vld [vmem:[#allocation19 + $0x10] sm:$0xff] }
 0x49e   : > { %1425 = vperm.xlu1 %2139, %v1419_v3   ;;  %v1577_v3 = vld [vmem:[#allocation19 + $0x18] sm:$0xff] }
 0x49f   : > { %2003 = vmatpush3.msra.mxu0 %v1577_v3 }
 0x4a0   : > { %2004 = vmatprep.subr.mxu0 %v2455_v0 }
 0x4a1   : > { %2005 = vmatpush3.msra.mxu0 %v1576_v4 }
 0x4a2   : > { %1253 = vrot.lane.b32.xlu1 %v761_v44, %s2458_s18  ;;  %2006 = vmatprep.subr.mxu0 %v2455_v0 }
 0x4a6   : > { %1447 = vrot.lane.b32.xlu1 %v761_v44, %s2459_s1 }
 0x4ca   : > { %859 = vadd.xlane.f32.xlu1 %v858_v5  ;;  %v1575_v5 = vld [vmem:[#allocation19 + $0x8] sm:$0xff] }
 0x4cb   : > { %2007 = vmatpush3.msra.mxu0 %v1575_v5 }
 0x4cc   : > { %2008 = vmatprep.subr.mxu0 %v2455_v0 }
 0x4cd   : > { %2009 = vmatpush3.msra.mxu0 %v1574_v6 }
 0x511   : > { %v1037_v8 = vpop.permute.xlu1 %1036 }
 0x512   : > { %v1039_v9 = vsub.f32 %v1021_v56, %v1037_v8 }
 0x514   : > { %v1040_v11 = vmul.f32 1.442695, %v1039_v9 }
 0x515   : > { %v1060_v12 = vpop.permute.xlu1 %1059 }
 0x516   : > { %2142 = vpow2.f32 %v1040_v11  ;;  %1978 = vmatpush3.msra.mxu1 %v1060_v12 }
 0x517   : > { %1987 = vmatprep.subr.mxu1 %v2455_v0  ;;  %2144 = vpow2.f32 %v1235_v10 }
 0x519   : > { %v1426_v13 = vpop.permute.xlu1 %1425 }
 0x51a   : > { %v1428_v14 = vsub.f32 %v2800_v38, %v1426_v13  ;;  %v1043_v38 = vld [vmem:[#allocation4 + $0x8] sm:$0xff] }
 0x51c   : > { %v1429_v15 = vmul.f32 1.442695, %v1428_v14 }
 0x51d   : > { %v1254_v16 = vpop.permute.xlu1 %1253 }
 0x51e   : > { %2146 = vpow2.f32 %v1429_v15 }
 0x51f   : > { %2148 = vpow2.f32 %v1032_v23 }
 0x520   : > { %2150 = vpow2.f32 %v846_v25 }
 0x521   : > { %v1448_v20 = vpop.permute.xlu1 %1447  ;;  %2152 = vpow2.f32 %v1227_v26 }
 0x522   : > { %2154 = vpow2.f32 %v1421_v27 }
 0x523   : > { %v2143_v17 = vpop.eup %2142 }
 0x524   : > { %1980 = vmatmul.mubr.msk.f32.vlgmr.msra.gmra.mxu1 %vm763_vm2, %v2143_v17  ;;  %v1045_v18 = vsel %vm763_vm2, %v2143_v17, 0.0  ;;  %v2145_v19 = vpop.eup %2144 }
 0x525   : > { %1988 = vmatpush3.msra.mxu1 %v1254_v16  ;;  %1046 = vadd.xlane.f32.xlu0 %v1045_v18  ;;  %v1240_v21 = vsel %vm763_vm2, %v2145_v19, 0.0 }
 0x526   : > { %1989 = vmatprep.mubr.msk.f32.mxu1 %vm2456_vm1, %v2455_v0  ;;  %1997 = vmatprep.subr.mxu1 %v2455_v0 }
 0x528   : > { %1990 = vmatmul.mubr.msk.f32.vlgmr.msra.gmra.mxu1 %vm763_vm2, %v2145_v19 }
 0x529   : > { %1998 = vmatpush3.msra.mxu1 %v1448_v20  ;;  %1241 = vadd.xlane.f32.xlu0 %v1240_v21 }
 0x52a   : > { %1999 = vmatprep.mubr.msk.f32.mxu1 %vm2456_vm1, %v2455_v0 }
 0x52b   : > { %v2147_v22 = vpop.eup %2146 }
 0x52c   : > { %2000 = vmatmul.mubr.msk.f32.vlgmr.msra.gmra.mxu1 %vm763_vm2, %v2147_v22  ;;  %v1434_v24 = vsel %vm763_vm2, %v2147_v22, 0.0  ;;  %v2149_v28 = vpop.eup %2148 }
 0x52d   : > { %1435 = vadd.xlane.f32.xlu1 %v1434_v24  ;;  %v2151_v29 = vpop.eup %2150  ;;  %v1044_v39 = vmul.f32 %v2149_v28, %v1043_v38 }
 0x52e   : > { %v2153_v30 = vpop.eup %2152  ;;  %v857_v33 = vmul.f32 %v2151_v29, %v856_v32 }
 0x52f   : > { %v2155_v31 = vpop.eup %2154  ;;  %v1239_v43 = vmul.f32 %v2153_v30, %v1238_v41 }
 0x530   : > { %v1433_v47 = vmul.f32 %v2155_v31, %v1432_v45 }
 0x53e   : > { %1054 = vperm.xlu1 %2139, %v2149_v28  }
 0x53f   : > { %868 = vperm.xlu0 %2138, %v2151_v29  }
 0x543   : > { %1249 = vperm.xlu0 %2138, %v2153_v30  }
 0x547   : > { %1443 = vperm.xlu0 %2138, %v2155_v31  }
 0x553   : > { %v860_v34 = vpop.xlane.xlu1 %859 }
 0x554   : > { %v861_v35 = vadd.f32 %v860_v34, %v857_v33  ;;  %v1887_v34 = vld [vmem:[%s2937_s7] ss:$0 sm:$0xff] }
 0x556   : > { %863 = vst.msk [vmem:[#allocation4] sm:$0xff] %vm581_vm3, %v861_v35 }
 0x55d   : > { %v1533_v36 = vld [vmem:[#allocation4] sm:$0xff] }
 0x55e   : > { %2156 = vrcp.f32 %v1533_v36 }
 0x56b   : > { %v2157_v37 = vpop.eup %2156 }
 0x56c   : > { %1538 = vperm.xlu0 %2138, %v2157_v37  }
 0x5ae   : > { %v1047_v40 = vpop.xlane.xlu0 %1046 }
 0x5af   : > { %v1048_v42 = vadd.f32 %v1047_v40, %v1044_v39 }
 0x5b1   : > { %1049 = vst.msk [vmem:[#allocation4 + $0x8] sm:$0xff] %vm581_vm3, %v1048_v42 }
 0x5b2   : > { %v1242_v44 = vpop.xlane.xlu0 %1241 }
 0x5b3   : > { %v1243_v46 = vadd.f32 %v1242_v44, %v1239_v43 }
 0x5b5   : > { %1244 = vst.msk [vmem:[#allocation4 + $0x10] sm:$0xff] %vm581_vm3, %v1243_v46 }
 0x5b6   : > { %v1436_v48 = vpop.xlane.xlu1 %1435 }
 0x5b7   : > { %v1437_v49 = vadd.f32 %v1436_v48, %v1433_v47 }
 0x5b8   : > { %v1543_v57 = vld [vmem:[#allocation4 + $0x8] sm:$0xff] }
 0x5b9   : > { %1438 = vst.msk [vmem:[#allocation4 + $0x18] sm:$0xff] %vm581_vm3, %v1437_v49 }
 0x5ba   : > { %v869_v51 = vpop.permute.xlu0 %868  ;;  %v1055_v8 = vpop.permute.xlu1 %1054 }
 0x5bb   : > { %v871_v52 = vmul.f32 %v869_v51, %v865_v50 }
 0x5bc   : > { %v1553_v53 = vld [vmem:[#allocation4 + $0x10] sm:$0xff] }
 0x5bd   : > { %v945_v55 = vadd.f32 %v2832_v54, %v871_v52  ;;  %2158 = vrcp.f32 %v1553_v53 }
 0x5be   : > { %2160 = vrcp.f32 %v1543_v57  ;;  %v1250_v12 = vpop.permute.xlu0 %1249 }
 0x5bf   : > { %946 = vst.msk [vmem:[#allocation5] sm:$0xff] %vm763_vm2, %v945_v55 }
 0x5c0   : > { %v1563_v59 = vld [vmem:[#allocation4 + $0x18] sm:$0xff] }
 0x5c1   : > { %2162 = vrcp.f32 %v1563_v59 }
 0x5c2   : > { %v1444_v17 = vpop.permute.xlu0 %1443 }
 0x5c6   : > { %v1051_v7 = vld [vmem:[#allocation5] sm:$0xff] }
 0x5c7   : > { %v1057_v9 = vmul.f32 %v1055_v8, %v1051_v7 }
 0x5ca   : > { %v2159_v56 = vpop.eup %2158 }
 0x5cb   : > { %1558 = vperm.xlu0 %2138, %v2159_v56   ;;  %v2161_v1 = vpop.eup %2160 }
 0x5ce   : > { %v2163_v2 = vpop.eup %2162 }
 0x5e4   : > { %v1131_v58 = vpop.f32.mrf.mxu1 }
 0x5e5   : > { %1136 = vrot.lane.b32.xlu1 %v1131_v58, %s2462_s14 }
 0x5e6   : > { %v1981_v60 = vpop.f32.mrf.mxu1 }
 0x5e7   : > { %v1539_v21 = vpop.permute.xlu0 %1538 }
 0x5e8   : > { %v1325_v61 = vpop.f32.mrf.mxu1 }
 0x5e9   : > { %1330 = vrot.lane.b32.xlu1 %v1325_v61, %s2463_s10 }
 0x5ea   : > { %v1991_v62 = vpop.f32.mrf.mxu1 }
 0x5ec   : > { %v1519_v63 = vpop.f32.mrf.mxu1 }
 0x5ed   : > { %1524 = vrot.lane.b32.xlu1 %v1519_v63, %s2464_s3 }
 0x5ee   : > { %v2001_v54 = vpop.f32.mrf.mxu1 }
 0x5f1   : > { %1548 = vperm.xlu1 %2139, %v2161_v1  }
 0x5f5   : > { %1568 = vperm.xlu1 %2139, %v2163_v2  }
 0x646   : > { %v1559_v27 = vpop.permute.xlu0 %1558 }
 0x657   : > { %v1137_v10 = vpop.permute.xlu1 %1136 }
 0x658   : > { %v1139_v11 = vadd.f32 %v1137_v10, %v1057_v9 }
 0x65a   : > { %1141 = vst.msk [vmem:[#allocation5] sm:$0xff] %vm1140_vm4, %v1139_v11 }
 0x65b   : > { %v1331_v15 = vpop.permute.xlu1 %1330 }
 0x65f   : > { %v1525_v19 = vpop.permute.xlu1 %1524 }
 0x661   : > { %v1246_v13 = vld [vmem:[#allocation5] sm:$0xff] }
 0x662   : > { %v1252_v14 = vmul.f32 %v1250_v12, %v1246_v13 }
 0x664   : > { %v1333_v16 = vadd.f32 %v1331_v15, %v1252_v14 }
 0x666   : > { %1335 = vst.msk [vmem:[#allocation5] sm:$0xff] %vm1334_vm5, %v1333_v16 }
 0x66c   : > { %v1549_v25 = vpop.permute.xlu1 %1548 }
 0x66d   : > { %v1440_v18 = vld [vmem:[#allocation5] sm:$0xff] }
 0x66e   : > { %v1446_v0 = vmul.f32 %v1444_v17, %v1440_v18 }
 0x670   : > { %v1527_v20 = vadd.f32 %v1525_v19, %v1446_v0  ;;  %v1569_v31 = vpop.permute.xlu1 %1568 }
 0x672   : > { %1529 = vst.msk [vmem:[#allocation5] sm:$0xff] %vm1528_vm6, %v1527_v20 }
 0x679   : > { %v1535_v22 = vld [vmem:[#allocation5] sm:$0xff] }
 0x67a   : > { %v1541_v23 = vmul.f32 %v1539_v21, %v1535_v22 }
 0x67c   : > { %1542 = vst.msk [vmem:[#allocation5] sm:$0xff] %vm763_vm2, %v1541_v23 }
 0x683   : > { %v1545_v24 = vld [vmem:[#allocation5] sm:$0xff] }
 0x684   : > { %v1551_v26 = vmul.f32 %v1549_v25, %v1545_v24 }
 0x686   : > { %1552 = vst.msk [vmem:[#allocation5] sm:$0xff] %vm1140_vm4, %v1551_v26 }
 0x68d   : > { %v1555_v28 = vld [vmem:[#allocation5] sm:$0xff] }
 0x68e   : > { %v1561_v29 = vmul.f32 %v1559_v27, %v1555_v28 }
 0x690   : > { %1562 = vst.msk [vmem:[#allocation5] sm:$0xff] %vm1334_vm5, %v1561_v29 }
 0x697   : > { %v1565_v30 = vld [vmem:[#allocation5] sm:$0xff] }
 0x698   : > { %v1571_v32 = vmul.f32 %v1569_v31, %v1565_v30 }
 0x69a   : > { %1572 = vst.msk [vmem:[#allocation5] sm:$0xff] %vm1528_vm6, %v1571_v32 }
 0x6a1   : > { %v1573_v33 = vld [vmem:[#allocation5] sm:$0xff] }
 0x6a2   : > { %2011 = vmatmul.mubr.msk.f32.vlgmr.msra.gmra.mxu0 %vm505_vm0, %v1573_v33 }
 0x762   : > { %v1655_v35 = vpop.f32.mrf.mxu0 }
 0x763   : > { %v1656_v36 = vadd.f32 %v1887_v34, %v1655_v35 }
 0x764   : > { %v2012_v37 = vpop.f32.mrf.mxu0 }
 0x765   : > { %1659 = vst.msk [vmem:[%s491_s20] sm:$0xff] %vm505_vm0, %v1656_v36 }
 0x766   : > { %2365 = shalt.err (!%p2362_p4)
}
 0x767   : > { %s2366_s9 = scalar_lea.hbm %s2887_s17, 128  ;;  %s2370_s25 = scalar_lea.hbm %s2938_s8, 256 }
 0x768   : > { %p2367_p8 = scmp.ne.s32.totalorder %s2887_s17, %s2366_s9  ;;  %p2371_p0 = scmp.lt.s32.totalorder %s2887_s17, %s2938_s8 }
 0x769   : > { %p2372_p13 = scmp.lt.s32.totalorder %s2370_s25, %s2366_s9 }
 0x76a   : > { %p2368_p6 = pnand %p2367_p8, %p2986_p12 }
 0x76b   : > { %p2373_p9 = por %p2372_p13, %p2371_p0 }
 0x76c   : > { %p2369_p3 = pneg %p2368_p6 }
 0x76e   : > { %p2374_p11 = pnand %p2373_p9, %p2369_p3 }
 0x770   : > { %2377 = shalt.err (!%p2374_p11)
}
 0x771   : > { %2035 = dma.vmem_to_hbm [thread:$0]  (%p2986_p12), %s1676_s13, 128, %s2887_s17, %s1661_s19  }
 0x772 PF: > { %s2987_s1 = sld [smem:[#allocation26_spill]] }
 0x773   : > { %s2988_s14 = sld [smem:[#allocation31_spill]] }
 0x774   : > { %s2989_s10 = sld [smem:[#allocation28_spill]] }
 0x778   : > { %s1687_s3 = sand.u32 1, %s2987_s1  }
 0x779   : > { %p2990_p2 = scmp.ne.s32.totalorder %s2988_s14, 0  ;;  %s1688_s23 = scalar_lea.sflag [#allocation10], %s1687_s3 }
 0x77a   : > { %p2991_p5 = scmp.ge.s32.totalorder %s2989_s10, 2 }
 0x77c   : > { %p2061_p10 = pnand %p2991_p5, %p2990_p2 }
 0x77e   : > { %p2062_p1 = pneg %p2061_p10 }
 0x780   : > { %2419 = dma.done.wait (%p2062_p1), %s1688_s23, 128  }
 0x781   : > { %2421 = vsyncadd (%p2062_p1), %s1688_s23, 4294967168  ;;  %s29_s10 = sadd.s32 1, %s2989_s10   ;;  %s2992_s21 = sld [smem:[#allocation30_spill]] }
 0x782   : > { %p26_p7 = scmp.ge.s32.totalorder %s29_s10, 4   ;;  %s2993_s30 = sld [smem:[#allocation27_spill]] }
 0x783   : > { %s2994_s9 = sld [smem:[#allocation29_spill]]  ;;  %s2995_s27 = smov %s2428_s28 }
 0x784   : > { %s2996_s28 = smov %s2432_s29  ;;  %28 = sbr.rel (!%p26_p7) target bundleno = 15 (0xf), region = 159 }
 0x787   : > { %s2997_s29 = smov %s2992_s21 }
 0x789   :  { %1693 = vsyncpa [#allocation9], 1 }
 0x78a   :  { %1695 = vsyncpa [#allocation9 + $0x1], 1 }
 0x78b   :  { %1696 = vsyncpa [#allocation12], 1 }
 0x78c   :  { %1698 = vsyncpa [#allocation12 + $0x1], 1 }
 0x78d   :  { %1699 = vsyncpa [#allocation15], 1 }
 0x78e   :  { %1700 = vsyncpa [#allocation18], 1 }
 0x78f   :  { %1701 = vsyncpa [#allocation10], 1 }
 0x790   :  { %1703 = vsyncpa [#allocation10 + $0x1], 1 }

</bundles_post_ra>
